<compile_context>
chip_gen: v6e
topology: v6e:2x2x1
jax: 0.10.0
libtpu: 0.0.40
codegen_flags: <defaults>
</compile_context>

<pallas_src>
import jax
import jax.numpy as jnp
from jax import lax
from jax.experimental import pallas as pl
from jax.experimental.pallas import tpu as pltpu


def gru_attn_dense_kernel(x_ref, asp_ref,
                          wia_ref, wix_ref, bi0_ref,
                          whh_ref, bhn_ref,
                          vh_ref,
                          wd_ref, bd_ref,
                          out_ref,
                          gi_ref, h_ref):
    """Fused GRU recurrence + folded bi-linear attention + dense head.

    x_ref:   (L*Bp, E)      time-major text embeddings (row t*Bp + b == (b, t))
    asp_ref: (Bp, E)        pooled aspect embedding (batch padded to Bp)
    wia_ref: (E, 3*Hp)      aspect half of W_ih, per-gate lane-padded
    wix_ref: (E, 3*Hp)      text half of W_ih, per-gate lane-padded (fused)
    bi0_ref: (1, 3*Hp)      b_ih + [b_hr, b_hz, 0], per-gate lane-padded
    whh_ref: (Hp, 3*Hp)     fused recurrent weights, padded
    bhn_ref: (1, Hp)        b_hn (stays inside r*(...))
    vh_ref:  (1, Hp)        folded attention vector (h part of Wk @ qw)
    wd_ref:  (Hp, Pp)       dense head, padded
    out_ref: (Bp, Pp)       lane-dense logits
    gi_ref:  (L, Bp, 3*Hp)  scratch: hoisted input projection (+ invariants)
    h_ref:   (L, Bp, Hp)    scratch: all hidden states (attention post-loop)
    """
    Bp, E = asp_ref.shape
    LB = x_ref.shape[0]
    L = LB // Bp
    Hp3 = whh_ref.shape[1]
    Hp = Hp3 // 3

    # ---- prologue: one fused, lane-padded input projection over all t ----
    gi_x = jnp.dot(x_ref[...], wix_ref[...],
                   preferred_element_type=jnp.float32)              # (L*Bp, 3Hp)
    gia = (jnp.dot(asp_ref[...], wia_ref[...],
                   preferred_element_type=jnp.float32)
           + bi0_ref[...])                                          # (Bp, 3Hp)
    # fold all loop-invariant terms into the scratch (tile-aligned reshape:
    # 64 rows -> 8 groups of 8 sublanes, lane dim unchanged)
    gi_ref[...] = gi_x.reshape(L, Bp, Hp3) + gia[None, :, :]

    # hoisted broadcast (JAX does not CSE broadcast_in_dim inside the loop)
    bhn = jnp.broadcast_to(bhn_ref[...], (Bp, Hp))                  # (Bp, Hp)

    # ---- serial recurrence: ONE fused matmul + gate math per step --------
    def step(t, h):
        gi = gi_ref[t]                                              # (Bp, 3Hp)
        gh = jnp.dot(h, whh_ref[...],
                     preferred_element_type=jnp.float32)            # (Bp, 3Hp)
        r = jax.nn.sigmoid(gi[:, 0:Hp] + gh[:, 0:Hp])
        z = jax.nn.sigmoid(gi[:, Hp:2 * Hp] + gh[:, Hp:2 * Hp])
        n = jnp.tanh(gi[:, 2 * Hp:] + r * (gh[:, 2 * Hp:] + bhn))
        h_new = (1.0 - z) * n + z * h                               # (Bp, Hp)
        h_ref[t] = h_new
        return h_new

    h0 = jnp.zeros((Bp, Hp), jnp.float32)
    lax.fori_loop(0, L, step, h0, unroll=True)

    # ---- attention over time (post-loop, no online-softmax carry) --------
    # logit_tb = h_tb . vh  (aspect / bias terms are constant over t and
    # cancel exactly under the softmax over time).
    h_all = h_ref[...]                                              # (L, Bp, Hp)
    logits = jnp.sum(h_all * vh_ref[...][None, :, :],
                     axis=-1, keepdims=True)                        # (L, Bp, 1)
    m = jnp.max(logits, axis=0, keepdims=True)                      # (1, Bp, 1)
    p = jnp.exp(logits - m)                                         # (L, Bp, 1)
    l = jnp.sum(p, axis=0, keepdims=True)                           # (1, Bp, 1)
    score = p / l                                                   # (L, Bp, 1)
    ctx = jnp.sum(h_all * score, axis=0)                            # (Bp, Hp)

    # ---- dense head (lane-dense store) ------------------------------------
    out_ref[...] = (jnp.dot(ctx, wd_ref[...],
                            preferred_element_type=jnp.float32)
                    + bd_ref[...])                                  # (Bp, Pp)


def gru_bayes_head(x_flat, asp_p, kp):
    LB = x_flat.shape[0]
    Bp = asp_p.shape[0]
    L = LB // Bp
    Hp3 = kp["whh_p"].shape[1]
    Hp = Hp3 // 3
    Pp = kp["wd_p"].shape[1]

    args = (x_flat, asp_p,
            kp["wia"], kp["wix"], kp["bi0"],
            kp["whh_p"], kp["bhn"],
            kp["vh"],
            kp["wd_p"], kp["bd_p"])

    # scoped-VMEM budget: flat sum of resident arrays with 2x headroom,
    # clamped to [16 MiB, 48 MiB] (48 MiB cap keeps headroom on v7x's 64 MiB).
    arg_bytes = sum(int(a.size) * 4 for a in args) + Bp * Pp * 4
    scratch_bytes = (L * Bp * Hp3 + L * Bp * Hp) * 4
    vmem_limit = int(min(48 << 20, max(16 << 20, 2 * (arg_bytes + scratch_bytes))))

    return pl.pallas_call(
        gru_attn_dense_kernel,
        out_shape=jax.ShapeDtypeStruct((Bp, Pp), jnp.float32),
        in_specs=[pl.BlockSpec(memory_space=pltpu.MemorySpace.VMEM)
                  for _ in args],
        out_specs=pl.BlockSpec(memory_space=pltpu.MemorySpace.VMEM),
        scratch_shapes=[pltpu.VMEM((L, Bp, Hp3), jnp.float32),
                        pltpu.VMEM((L, Bp, Hp), jnp.float32)],
        compiler_params=pltpu.CompilerParams(vmem_limit_bytes=vmem_limit),
    )(*args)


def gru_bayes_forward(text_indices, aspect_indices, embedding, params):
    """Glue (plain JAX): embedding lookup, aspect pooling, layout/weight prep."""
    aspect_len = jnp.sum(aspect_indices != 0, axis=-1).astype(jnp.float32)
    aspect_len = jnp.maximum(aspect_len, 1.0)            # guard div-by-zero
    x = embedding[text_indices]                          # (B, L, E)
    # SqueezeEmbedding: trims to max(x_len); inputs are constructed so that
    # max(x_len) == L, hence this is the identity here.
    aspect = embedding[aspect_indices]                   # (B, La, E)
    aspect_pool = jnp.sum(aspect, axis=1) / aspect_len[:, None]     # (B, E)

    B, L, E = x.shape
    H = params["whh"].shape[0]
    P = params["wd"].shape[1]
    Hp = ((H + 127) // 128) * 128                        # per-gate lane pad
    Pp = ((P + 127) // 128) * 128

    # ---- batch padded to a sublane multiple (8 for f32) -------------------
    Bp = ((B + 7) // 8) * 8
    x_p = jnp.zeros((Bp, L, E), jnp.float32).at[:B].set(x)
    asp_p = jnp.zeros((Bp, E), jnp.float32).at[:B].set(aspect_pool)
    # time-major flat layout: row t*Bp + b  <->  (batch b, time t)
    x_flat = jnp.transpose(x_p, (1, 0, 2)).reshape(L * Bp, E)

    # ---- weight preprocessing (layout + algebraic folding only) -----------
    def pad_gates(w):
        # (R, 3H) -> (R, 3*Hp): gate g's H columns placed at [g*Hp, g*Hp+H)
        R = w.shape[0]
        out = jnp.zeros((R, 3 * Hp), jnp.float32)
        for g in range(3):
            out = out.at[:, g * Hp:g * Hp + H].set(w[:, g * H:(g + 1) * H])
        return out

    wih = params["wih"]                  # (2E, 3H): rows [aspect | text]
    wia = pad_gates(wih[:E, :])          # aspect half (applied once / sample)
    wix = pad_gates(wih[E:, :])          # text half, fused, lane-padded
    whh_p = jnp.zeros((Hp, 3 * Hp), jnp.float32).at[:H, :].set(
        pad_gates(params["whh"]))

    bih_p = pad_gates(params["bih"])     # (1, 3Hp)
    bhh_p = pad_gates(params["bhh"])     # (1, 3Hp)
    # pre-fold b_hr / b_hz into the input-side bias; b_hn stays inside r*(...)
    bi0 = bih_p + bhh_p.at[:, 2 * Hp:].set(0.0)
    bhn = bhh_p[:, 2 * Hp:3 * Hp]        # (1, Hp)

    # NoQueryAttention (bi_linear), folded to a single H-vector:
    #   logit = sum((ha@Wk + bk) * qw) = h @ (Wk_h @ qw) + const(b)
    # with ha = [h_t, aspect_pool]; per-row constants cancel in the softmax
    # over time, so only the h part survives.
    qx = params["q"] @ params["wq"] + params["bq"]       # (1, H+E)
    qw = (qx @ params["w_bil"])[0]                       # (H+E,)
    v = params["wk"] @ qw                                # (H+E,)
    vh = jnp.zeros((1, Hp), jnp.float32).at[0, :H].set(v[:H])

    # lane-dense dense head: pad polarity dim, slice after the call
    wd_p = jnp.zeros((Hp, Pp), jnp.float32).at[:H, :P].set(params["wd"])
    bd_p = jnp.zeros((1, Pp), jnp.float32).at[:, :P].set(params["bd"])

    out_pad = gru_bayes_head(x_flat, asp_p, dict(
        wia=wia, wix=wix, bi0=bi0,
        whh_p=whh_p, bhn=bhn, vh=vh,
        wd_p=wd_p, bd_p=bd_p))
    return out_pad[:B, :P]


def reference_forward(text_indices, aspect_indices, embedding, params):
    """Pure-JAX reference mirroring the PyTorch forward."""
    aspect_len = jnp.sum(aspect_indices != 0, axis=-1).astype(jnp.float32)
    x = embedding[text_indices]
    aspect = embedding[aspect_indices]
    aspect_pool = jnp.sum(aspect, axis=1) / aspect_len[:, None]
    B, L, E = x.shape
    H = params["whh"].shape[0]
    asp_b = jnp.broadcast_to(aspect_pool[:, None, :], (B, L, E))
    xc = jnp.concatenate([asp_b, x], axis=-1)

    h = jnp.zeros((B, H), jnp.float32)
    hs = []
    for t in range(L):
        x_t = xc[:, t, :]
        gi = x_t @ params["wih"] + params["bih"]
        gh = h @ params["whh"] + params["bhh"]
        r = jax.nn.sigmoid(gi[:, :H] + gh[:, :H])
        z = jax.nn.sigmoid(gi[:, H:2 * H] + gh[:, H:2 * H])
        n = jnp.tanh(gi[:, 2 * H:] + r * gh[:, 2 * H:])
        h = (1.0 - z) * n + z * h
        hs.append(h)
    hs = jnp.stack(hs, axis=1)                          # (B, L, H)

    ha = jnp.concatenate([hs, asp_b], axis=-1)          # (B, L, H+E)
    kx = ha @ params["wk"] + params["bk"]
    qw = (params["q"] @ params["wq"] + params["bq"]) @ params["w_bil"]
    logits = jnp.einsum("bld,d->bl", kx, qw[0])
    score = jax.nn.softmax(logits, axis=-1)
    ctx = jnp.einsum("bl,blh->bh", score, hs)
    return ctx @ params["wd"] + params["bd"]


def init_params(key, E, H, P):
    D = H + E
    ks = jax.random.split(key, 12)
    s = 0.1
    return {
        "wih":   jax.random.normal(ks[0], (2 * E, 3 * H), jnp.float32) * s,
        "whh":   jax.random.normal(ks[1], (H, 3 * H), jnp.float32) * s,
        "bih":   jax.random.normal(ks[2], (1, 3 * H), jnp.float32) * s,
        "bhh":   jax.random.normal(ks[3], (1, 3 * H), jnp.float32) * s,
        "wk":    jax.random.normal(ks[4], (D, D), jnp.float32) * s,
        "bk":    jax.random.normal(ks[5], (1, D), jnp.float32) * s,
        "wq":    jax.random.normal(ks[6], (D, D), jnp.float32) * s,
        "bq":    jax.random.normal(ks[7], (1, D), jnp.float32) * s,
        "q":     jax.random.normal(ks[8], (1, D), jnp.float32) * s,
        "w_bil": jax.random.normal(ks[9], (D, D), jnp.float32) * s,
        "wd":    jax.random.normal(ks[10], (H, P), jnp.float32) * s,
        "bd":    jax.random.normal(ks[11], (1, P), jnp.float32) * s,
    }


if __name__ == "__main__":
    key = jax.random.PRNGKey(0)
    V, E, H, P = 50, 32, 32, 3          # vocab, embed_dim, hidden_dim, polarities
    B, L, La = 2, 8, 4                  # batch, text len, aspect len

    k_emb, k_txt, k_asp, k_par = jax.random.split(key, 4)
    embedding = jax.random.normal(k_emb, (V, E), jnp.float32) * 0.5
    embedding = embedding.at[0].set(0.0)        # padding row (index 0) = zeros

    text_indices = jax.random.randint(k_txt, (B, L), 1, V)
    text_indices = text_indices.at[1, L - 2:].set(0)   # row 1 padded; row 0
                                                       # full -> max len == L
    aspect_indices = jax.random.randint(k_asp, (B, La), 1, V)
    aspect_indices = aspect_indices.at[1, La - 1:].set(0)

    params = init_params(k_par, E, H, P)

    fwd = jax.jit(gru_bayes_forward)
    out = jax.block_until_ready(fwd(text_indices, aspect_indices, embedding, params))

    ref = reference_forward(text_indices, aspect_indices, embedding, params)
    assert out.shape == (B, P)
    assert bool(jnp.all(jnp.isfinite(out)))
    # folding is algebraically exact -> tight tolerance catches layout bugs
    assert float(jnp.max(jnp.abs(out - ref))) < 1e-3, (out, ref)

    print("KERNEL_OK")
</pallas_src>

<mosaic_0001>
module attributes {stable_mosaic.version = 11 : i64} {
  func.func @gru_attn_dense_kernel(%arg0: memref<64x32xf32, #tpu.memory_space<vmem>>, %arg1: memref<8x32xf32, #tpu.memory_space<vmem>>, %arg2: memref<32x384xf32, #tpu.memory_space<vmem>>, %arg3: memref<32x384xf32, #tpu.memory_space<vmem>>, %arg4: memref<1x384xf32, #tpu.memory_space<vmem>>, %arg5: memref<128x384xf32, #tpu.memory_space<vmem>>, %arg6: memref<1x128xf32, #tpu.memory_space<vmem>>, %arg7: memref<1x128xf32, #tpu.memory_space<vmem>>, %arg8: memref<128x128xf32, #tpu.memory_space<vmem>>, %arg9: memref<1x128xf32, #tpu.memory_space<vmem>>, %arg10: memref<8x128xf32, #tpu.memory_space<vmem>>, %arg11: memref<8x8x384xf32, #tpu.memory_space<vmem>>, %arg12: memref<8x8x128xf32, #tpu.memory_space<vmem>>) attributes {dimension_semantics = [], scalar_prefetch = 0 : i64, scratch_operands = 2 : i64, tpu.core_type = #tpu.core_type<tc>} {
    %c0 = arith.constant 0 : index
    %c0_0 = arith.constant 0 : index
    %0 = vector.load %arg0[%c0, %c0_0] : memref<64x32xf32, #tpu.memory_space<vmem>>, vector<64x32xf32>
    %c0_1 = arith.constant 0 : index
    %c0_2 = arith.constant 0 : index
    %1 = vector.load %arg3[%c0_1, %c0_2] : memref<32x384xf32, #tpu.memory_space<vmem>>, vector<32x384xf32>
    %cst = arith.constant dense<0.000000e+00> : vector<64x384xf32>
    %2 = tpu.matmul %0, %1, %cst {dimension_numbers = #tpu.dot_dimension_numbers<[1], [0], [0], [1], [0, 0, 1, 1], [], []>} : vector<64x32xf32>, vector<32x384xf32>, vector<64x384xf32> -> vector<64x384xf32>
    %c0_3 = arith.constant 0 : index
    %c0_4 = arith.constant 0 : index
    %3 = vector.load %arg1[%c0_3, %c0_4] : memref<8x32xf32, #tpu.memory_space<vmem>>, vector<8x32xf32>
    %c0_5 = arith.constant 0 : index
    %c0_6 = arith.constant 0 : index
    %4 = vector.load %arg2[%c0_5, %c0_6] : memref<32x384xf32, #tpu.memory_space<vmem>>, vector<32x384xf32>
    %cst_7 = arith.constant dense<0.000000e+00> : vector<8x384xf32>
    %5 = tpu.matmul %3, %4, %cst_7 {dimension_numbers = #tpu.dot_dimension_numbers<[1], [0], [0], [1], [0, 0, 1, 1], [], []>} : vector<8x32xf32>, vector<32x384xf32>, vector<8x384xf32> -> vector<8x384xf32>
    %c0_8 = arith.constant 0 : index
    %c0_9 = arith.constant 0 : index
    %6 = vector.load %arg4[%c0_8, %c0_9] : memref<1x384xf32, #tpu.memory_space<vmem>>, vector<1x384xf32>
    %7 = vector.broadcast %6 : vector<1x384xf32> to vector<8x384xf32>
    %8 = arith.addf %5, %7 : vector<8x384xf32>
    %9 = vector.shape_cast %2 : vector<64x384xf32> to vector<8x8x384xf32>
    %10 = vector.shape_cast %8 : vector<8x384xf32> to vector<1x8x384xf32>
    %11 = vector.broadcast %10 : vector<1x8x384xf32> to vector<8x8x384xf32>
    %12 = arith.addf %9, %11 : vector<8x8x384xf32>
    %c0_10 = arith.constant 0 : index
    %c0_11 = arith.constant 0 : index
    %c0_12 = arith.constant 0 : index
    %13 = vector.load %arg11[%c0_10, %c0_11, %c0_12] : memref<8x8x384xf32, #tpu.memory_space<vmem>>, vector<8x8x384xf32>
    tpu.vector_store %arg11[%c0_10, %c0_11, %c0_12], %12 {strides = array<i32>} : memref<8x8x384xf32, #tpu.memory_space<vmem>>, vector<8x8x384xf32>,
    %c0_13 = arith.constant 0 : index
    %c0_14 = arith.constant 0 : index
    %14 = vector.load %arg6[%c0_13, %c0_14] : memref<1x128xf32, #tpu.memory_space<vmem>>, vector<1x128xf32>
    %15 = vector.shape_cast %14 : vector<1x128xf32> to vector<1x128xf32>
    %16 = vector.broadcast %15 : vector<1x128xf32> to vector<8x128xf32>
    %cst_15 = arith.constant 0.000000e+00 : f32
    %17 = vector.broadcast %cst_15 : f32 to vector<8x128xf32>
    %c0_i32 = arith.constant 0 : i32
    %18 = arith.index_cast %c0_i32 : i32 to index
    %c0_16 = arith.constant 0 : index
    %c0_17 = arith.constant 0 : index
    %19 = vector.load %arg11[%18, %c0_16, %c0_17] : memref<8x8x384xf32, #tpu.memory_space<vmem>>, vector<1x8x384xf32>
    %20 = vector.shape_cast %19 : vector<1x8x384xf32> to vector<8x384xf32>
    %c0_18 = arith.constant 0 : index
    %c0_19 = arith.constant 0 : index
    %21 = vector.load %arg5[%c0_18, %c0_19] : memref<128x384xf32, #tpu.memory_space<vmem>>, vector<128x384xf32>
    %cst_20 = arith.constant dense<0.000000e+00> : vector<8x384xf32>
    %22 = tpu.matmul %17, %21, %cst_20 {dimension_numbers = #tpu.dot_dimension_numbers<[1], [0], [0], [1], [0, 0, 1, 1], [], []>} : vector<8x128xf32>, vector<128x384xf32>, vector<8x384xf32> -> vector<8x384xf32>
    %23 = vector.extract_strided_slice %20 {offsets = [0, 0], sizes = [8, 128], strides = [1, 1]} : vector<8x384xf32> to vector<8x128xf32>
    %24 = vector.extract_strided_slice %22 {offsets = [0, 0], sizes = [8, 128], strides = [1, 1]} : vector<8x384xf32> to vector<8x128xf32>
    %25 = arith.addf %23, %24 : vector<8x128xf32>
    %26 = arith.negf %25 : vector<8x128xf32>
    %27 = math.exp %26 : vector<8x128xf32>
    %cst_21 = arith.constant 1.000000e+00 : f32
    %28 = vector.broadcast %cst_21 : f32 to vector<8x128xf32>
    %29 = arith.addf %28, %27 : vector<8x128xf32>
    %30 = arith.divf %28, %29 : vector<8x128xf32>
    %31 = vector.extract_strided_slice %20 {offsets = [0, 128], sizes = [8, 128], strides = [1, 1]} : vector<8x384xf32> to vector<8x128xf32>
    %32 = vector.extract_strided_slice %22 {offsets = [0, 128], sizes = [8, 128], strides = [1, 1]} : vector<8x384xf32> to vector<8x128xf32>
    %33 = arith.addf %31, %32 : vector<8x128xf32>
    %34 = arith.negf %33 : vector<8x128xf32>
    %35 = math.exp %34 : vector<8x128xf32>
    %cst_22 = arith.constant 1.000000e+00 : f32
    %36 = vector.broadcast %cst_22 : f32 to vector<8x128xf32>
    %37 = arith.addf %36, %35 : vector<8x128xf32>
    %38 = arith.divf %36, %37 : vector<8x128xf32>
    %39 = vector.extract_strided_slice %20 {offsets = [0, 256], sizes = [8, 128], strides = [1, 1]} : vector<8x384xf32> to vector<8x128xf32>
    %40 = vector.extract_strided_slice %22 {offsets = [0, 256], sizes = [8, 128], strides = [1, 1]} : vector<8x384xf32> to vector<8x128xf32>
    %41 = arith.addf %40, %16 : vector<8x128xf32>
    %42 = arith.mulf %30, %41 : vector<8x128xf32>
    %43 = arith.addf %39, %42 : vector<8x128xf32>
    %44 = math.tanh %43 : vector<8x128xf32>
    %cst_23 = arith.constant 1.000000e+00 : f32
    %45 = vector.broadcast %cst_23 : f32 to vector<8x128xf32>
    %46 = arith.subf %45, %38 : vector<8x128xf32>
    %47 = arith.mulf %46, %44 : vector<8x128xf32>
    %48 = arith.mulf %38, %17 : vector<8x128xf32>
    %49 = arith.addf %47, %48 : vector<8x128xf32>
    %50 = arith.index_cast %c0_i32 : i32 to index
    %c0_24 = arith.constant 0 : index
    %c0_25 = arith.constant 0 : index
    %51 = vector.load %arg12[%50, %c0_24, %c0_25] : memref<8x8x128xf32, #tpu.memory_space<vmem>>, vector<1x8x128xf32>
    %52 = vector.shape_cast %51 : vector<1x8x128xf32> to vector<8x128xf32>
    %53 = vector.shape_cast %49 : vector<8x128xf32> to vector<1x8x128xf32>
    tpu.vector_store %arg12[%50, %c0_24, %c0_25], %53 {strides = array<i32>} : memref<8x8x128xf32, #tpu.memory_space<vmem>>, vector<1x8x128xf32>,
    %c1_i32 = arith.constant 1 : i32
    %54 = arith.index_cast %c1_i32 : i32 to index
    %c0_26 = arith.constant 0 : index
    %c0_27 = arith.constant 0 : index
    %55 = vector.load %arg11[%54, %c0_26, %c0_27] : memref<8x8x384xf32, #tpu.memory_space<vmem>>, vector<1x8x384xf32>
    %56 = vector.shape_cast %55 : vector<1x8x384xf32> to vector<8x384xf32>
    %c0_28 = arith.constant 0 : index
    %c0_29 = arith.constant 0 : index
    %57 = vector.load %arg5[%c0_28, %c0_29] : memref<128x384xf32, #tpu.memory_space<vmem>>, vector<128x384xf32>
    %cst_30 = arith.constant dense<0.000000e+00> : vector<8x384xf32>
    %58 = tpu.matmul %49, %57, %cst_30 {dimension_numbers = #tpu.dot_dimension_numbers<[1], [0], [0], [1], [0, 0, 1, 1], [], []>} : vector<8x128xf32>, vector<128x384xf32>, vector<8x384xf32> -> vector<8x384xf32>
    %59 = vector.extract_strided_slice %56 {offsets = [0, 0], sizes = [8, 128], strides = [1, 1]} : vector<8x384xf32> to vector<8x128xf32>
    %60 = vector.extract_strided_slice %58 {offsets = [0, 0], sizes = [8, 128], strides = [1, 1]} : vector<8x384xf32> to vector<8x128xf32>
    %61 = arith.addf %59, %60 : vector<8x128xf32>
    %62 = arith.negf %61 : vector<8x128xf32>
    %63 = math.exp %62 : vector<8x128xf32>
    %cst_31 = arith.constant 1.000000e+00 : f32
    %64 = vector.broadcast %cst_31 : f32 to vector<8x128xf32>
    %65 = arith.addf %64, %63 : vector<8x128xf32>
    %66 = arith.divf %64, %65 : vector<8x128xf32>
    %67 = vector.extract_strided_slice %56 {offsets = [0, 128], sizes = [8, 128], strides = [1, 1]} : vector<8x384xf32> to vector<8x128xf32>
    %68 = vector.extract_strided_slice %58 {offsets = [0, 128], sizes = [8, 128], strides = [1, 1]} : vector<8x384xf32> to vector<8x128xf32>
    %69 = arith.addf %67, %68 : vector<8x128xf32>
    %70 = arith.negf %69 : vector<8x128xf32>
    %71 = math.exp %70 : vector<8x128xf32>
    %cst_32 = arith.constant 1.000000e+00 : f32
    %72 = vector.broadcast %cst_32 : f32 to vector<8x128xf32>
    %73 = arith.addf %72, %71 : vector<8x128xf32>
    %74 = arith.divf %72, %73 : vector<8x128xf32>
    %75 = vector.extract_strided_slice %56 {offsets = [0, 256], sizes = [8, 128], strides = [1, 1]} : vector<8x384xf32> to vector<8x128xf32>
    %76 = vector.extract_strided_slice %58 {offsets = [0, 256], sizes = [8, 128], strides = [1, 1]} : vector<8x384xf32> to vector<8x128xf32>
    %77 = arith.addf %76, %16 : vector<8x128xf32>
    %78 = arith.mulf %66, %77 : vector<8x128xf32>
    %79 = arith.addf %75, %78 : vector<8x128xf32>
    %80 = math.tanh %79 : vector<8x128xf32>
    %cst_33 = arith.constant 1.000000e+00 : f32
    %81 = vector.broadcast %cst_33 : f32 to vector<8x128xf32>
    %82 = arith.subf %81, %74 : vector<8x128xf32>
    %83 = arith.mulf %82, %80 : vector<8x128xf32>
    %84 = arith.mulf %74, %49 : vector<8x128xf32>
    %85 = arith.addf %83, %84 : vector<8x128xf32>
    %86 = arith.index_cast %c1_i32 : i32 to index
    %c0_34 = arith.constant 0 : index
    %c0_35 = arith.constant 0 : index
    %87 = vector.load %arg12[%86, %c0_34, %c0_35] : memref<8x8x128xf32, #tpu.memory_space<vmem>>, vector<1x8x128xf32>
    %88 = vector.shape_cast %87 : vector<1x8x128xf32> to vector<8x128xf32>
    %89 = vector.shape_cast %85 : vector<8x128xf32> to vector<1x8x128xf32>
    tpu.vector_store %arg12[%86, %c0_34, %c0_35], %89 {strides = array<i32>} : memref<8x8x128xf32, #tpu.memory_space<vmem>>, vector<1x8x128xf32>,
    %c2_i32 = arith.constant 2 : i32
    %90 = arith.index_cast %c2_i32 : i32 to index
    %c0_36 = arith.constant 0 : index
    %c0_37 = arith.constant 0 : index
    %91 = vector.load %arg11[%90, %c0_36, %c0_37] : memref<8x8x384xf32, #tpu.memory_space<vmem>>, vector<1x8x384xf32>
    %92 = vector.shape_cast %91 : vector<1x8x384xf32> to vector<8x384xf32>
    %c0_38 = arith.constant 0 : index
    %c0_39 = arith.constant 0 : index
    %93 = vector.load %arg5[%c0_38, %c0_39] : memref<128x384xf32, #tpu.memory_space<vmem>>, vector<128x384xf32>
    %cst_40 = arith.constant dense<0.000000e+00> : vector<8x384xf32>
    %94 = tpu.matmul %85, %93, %cst_40 {dimension_numbers = #tpu.dot_dimension_numbers<[1], [0], [0], [1], [0, 0, 1, 1], [], []>} : vector<8x128xf32>, vector<128x384xf32>, vector<8x384xf32> -> vector<8x384xf32>
    %95 = vector.extract_strided_slice %92 {offsets = [0, 0], sizes = [8, 128], strides = [1, 1]} : vector<8x384xf32> to vector<8x128xf32>
    %96 = vector.extract_strided_slice %94 {offsets = [0, 0], sizes = [8, 128], strides = [1, 1]} : vector<8x384xf32> to vector<8x128xf32>
    %97 = arith.addf %95, %96 : vector<8x128xf32>
    %98 = arith.negf %97 : vector<8x128xf32>
    %99 = math.exp %98 : vector<8x128xf32>
    %cst_41 = arith.constant 1.000000e+00 : f32
    %100 = vector.broadcast %cst_41 : f32 to vector<8x128xf32>
    %101 = arith.addf %100, %99 : vector<8x128xf32>
    %102 = arith.divf %100, %101 : vector<8x128xf32>
    %103 = vector.extract_strided_slice %92 {offsets = [0, 128], sizes = [8, 128], strides = [1, 1]} : vector<8x384xf32> to vector<8x128xf32>
    %104 = vector.extract_strided_slice %94 {offsets = [0, 128], sizes = [8, 128], strides = [1, 1]} : vector<8x384xf32> to vector<8x128xf32>
    %105 = arith.addf %103, %104 : vector<8x128xf32>
    %106 = arith.negf %105 : vector<8x128xf32>
    %107 = math.exp %106 : vector<8x128xf32>
    %cst_42 = arith.constant 1.000000e+00 : f32
    %108 = vector.broadcast %cst_42 : f32 to vector<8x128xf32>
    %109 = arith.addf %108, %107 : vector<8x128xf32>
    %110 = arith.divf %108, %109 : vector<8x128xf32>
    %111 = vector.extract_strided_slice %92 {offsets = [0, 256], sizes = [8, 128], strides = [1, 1]} : vector<8x384xf32> to vector<8x128xf32>
    %112 = vector.extract_strided_slice %94 {offsets = [0, 256], sizes = [8, 128], strides = [1, 1]} : vector<8x384xf32> to vector<8x128xf32>
    %113 = arith.addf %112, %16 : vector<8x128xf32>
    %114 = arith.mulf %102, %113 : vector<8x128xf32>
    %115 = arith.addf %111, %114 : vector<8x128xf32>
    %116 = math.tanh %115 : vector<8x128xf32>
    %cst_43 = arith.constant 1.000000e+00 : f32
    %117 = vector.broadcast %cst_43 : f32 to vector<8x128xf32>
    %118 = arith.subf %117, %110 : vector<8x128xf32>
    %119 = arith.mulf %118, %116 : vector<8x128xf32>
    %120 = arith.mulf %110, %85 : vector<8x128xf32>
    %121 = arith.addf %119, %120 : vector<8x128xf32>
    %122 = arith.index_cast %c2_i32 : i32 to index
    %c0_44 = arith.constant 0 : index
    %c0_45 = arith.constant 0 : index
    %123 = vector.load %arg12[%122, %c0_44, %c0_45] : memref<8x8x128xf32, #tpu.memory_space<vmem>>, vector<1x8x128xf32>
    %124 = vector.shape_cast %123 : vector<1x8x128xf32> to vector<8x128xf32>
    %125 = vector.shape_cast %121 : vector<8x128xf32> to vector<1x8x128xf32>
    tpu.vector_store %arg12[%122, %c0_44, %c0_45], %125 {strides = array<i32>} : memref<8x8x128xf32, #tpu.memory_space<vmem>>, vector<1x8x128xf32>,
    %c3_i32 = arith.constant 3 : i32
    %126 = arith.index_cast %c3_i32 : i32 to index
    %c0_46 = arith.constant 0 : index
    %c0_47 = arith.constant 0 : index
    %127 = vector.load %arg11[%126, %c0_46, %c0_47] : memref<8x8x384xf32, #tpu.memory_space<vmem>>, vector<1x8x384xf32>
    %128 = vector.shape_cast %127 : vector<1x8x384xf32> to vector<8x384xf32>
    %c0_48 = arith.constant 0 : index
    %c0_49 = arith.constant 0 : index
    %129 = vector.load %arg5[%c0_48, %c0_49] : memref<128x384xf32, #tpu.memory_space<vmem>>, vector<128x384xf32>
    %cst_50 = arith.constant dense<0.000000e+00> : vector<8x384xf32>
    %130 = tpu.matmul %121, %129, %cst_50 {dimension_numbers = #tpu.dot_dimension_numbers<[1], [0], [0], [1], [0, 0, 1, 1], [], []>} : vector<8x128xf32>, vector<128x384xf32>, vector<8x384xf32> -> vector<8x384xf32>
    %131 = vector.extract_strided_slice %128 {offsets = [0, 0], sizes = [8, 128], strides = [1, 1]} : vector<8x384xf32> to vector<8x128xf32>
    %132 = vector.extract_strided_slice %130 {offsets = [0, 0], sizes = [8, 128], strides = [1, 1]} : vector<8x384xf32> to vector<8x128xf32>
    %133 = arith.addf %131, %132 : vector<8x128xf32>
    %134 = arith.negf %133 : vector<8x128xf32>
    %135 = math.exp %134 : vector<8x128xf32>
    %cst_51 = arith.constant 1.000000e+00 : f32
    %136 = vector.broadcast %cst_51 : f32 to vector<8x128xf32>
    %137 = arith.addf %136, %135 : vector<8x128xf32>
    %138 = arith.divf %136, %137 : vector<8x128xf32>
    %139 = vector.extract_strided_slice %128 {offsets = [0, 128], sizes = [8, 128], strides = [1, 1]} : vector<8x384xf32> to vector<8x128xf32>
    %140 = vector.extract_strided_slice %130 {offsets = [0, 128], sizes = [8, 128], strides = [1, 1]} : vector<8x384xf32> to vector<8x128xf32>
    %141 = arith.addf %139, %140 : vector<8x128xf32>
    %142 = arith.negf %141 : vector<8x128xf32>
    %143 = math.exp %142 : vector<8x128xf32>
    %cst_52 = arith.constant 1.000000e+00 : f32
    %144 = vector.broadcast %cst_52 : f32 to vector<8x128xf32>
    %145 = arith.addf %144, %143 : vector<8x128xf32>
    %146 = arith.divf %144, %145 : vector<8x128xf32>
    %147 = vector.extract_strided_slice %128 {offsets = [0, 256], sizes = [8, 128], strides = [1, 1]} : vector<8x384xf32> to vector<8x128xf32>
    %148 = vector.extract_strided_slice %130 {offsets = [0, 256], sizes = [8, 128], strides = [1, 1]} : vector<8x384xf32> to vector<8x128xf32>
    %149 = arith.addf %148, %16 : vector<8x128xf32>
    %150 = arith.mulf %138, %149 : vector<8x128xf32>
    %151 = arith.addf %147, %150 : vector<8x128xf32>
    %152 = math.tanh %151 : vector<8x128xf32>
    %cst_53 = arith.constant 1.000000e+00 : f32
    %153 = vector.broadcast %cst_53 : f32 to vector<8x128xf32>
    %154 = arith.subf %153, %146 : vector<8x128xf32>
    %155 = arith.mulf %154, %152 : vector<8x128xf32>
    %156 = arith.mulf %146, %121 : vector<8x128xf32>
    %157 = arith.addf %155, %156 : vector<8x128xf32>
    %158 = arith.index_cast %c3_i32 : i32 to index
    %c0_54 = arith.constant 0 : index
    %c0_55 = arith.constant 0 : index
    %159 = vector.load %arg12[%158, %c0_54, %c0_55] : memref<8x8x128xf32, #tpu.memory_space<vmem>>, vector<1x8x128xf32>
    %160 = vector.shape_cast %159 : vector<1x8x128xf32> to vector<8x128xf32>
    %161 = vector.shape_cast %157 : vector<8x128xf32> to vector<1x8x128xf32>
    tpu.vector_store %arg12[%158, %c0_54, %c0_55], %161 {strides = array<i32>} : memref<8x8x128xf32, #tpu.memory_space<vmem>>, vector<1x8x128xf32>,
    %c4_i32 = arith.constant 4 : i32
    %162 = arith.index_cast %c4_i32 : i32 to index
    %c0_56 = arith.constant 0 : index
    %c0_57 = arith.constant 0 : index
    %163 = vector.load %arg11[%162, %c0_56, %c0_57] : memref<8x8x384xf32, #tpu.memory_space<vmem>>, vector<1x8x384xf32>
    %164 = vector.shape_cast %163 : vector<1x8x384xf32> to vector<8x384xf32>
    %c0_58 = arith.constant 0 : index
    %c0_59 = arith.constant 0 : index
    %165 = vector.load %arg5[%c0_58, %c0_59] : memref<128x384xf32, #tpu.memory_space<vmem>>, vector<128x384xf32>
    %cst_60 = arith.constant dense<0.000000e+00> : vector<8x384xf32>
    %166 = tpu.matmul %157, %165, %cst_60 {dimension_numbers = #tpu.dot_dimension_numbers<[1], [0], [0], [1], [0, 0, 1, 1], [], []>} : vector<8x128xf32>, vector<128x384xf32>, vector<8x384xf32> -> vector<8x384xf32>
    %167 = vector.extract_strided_slice %164 {offsets = [0, 0], sizes = [8, 128], strides = [1, 1]} : vector<8x384xf32> to vector<8x128xf32>
    %168 = vector.extract_strided_slice %166 {offsets = [0, 0], sizes = [8, 128], strides = [1, 1]} : vector<8x384xf32> to vector<8x128xf32>
    %169 = arith.addf %167, %168 : vector<8x128xf32>
    %170 = arith.negf %169 : vector<8x128xf32>
    %171 = math.exp %170 : vector<8x128xf32>
    %cst_61 = arith.constant 1.000000e+00 : f32
    %172 = vector.broadcast %cst_61 : f32 to vector<8x128xf32>
    %173 = arith.addf %172, %171 : vector<8x128xf32>
    %174 = arith.divf %172, %173 : vector<8x128xf32>
    %175 = vector.extract_strided_slice %164 {offsets = [0, 128], sizes = [8, 128], strides = [1, 1]} : vector<8x384xf32> to vector<8x128xf32>
    %176 = vector.extract_strided_slice %166 {offsets = [0, 128], sizes = [8, 128], strides = [1, 1]} : vector<8x384xf32> to vector<8x128xf32>
    %177 = arith.addf %175, %176 : vector<8x128xf32>
    %178 = arith.negf %177 : vector<8x128xf32>
    %179 = math.exp %178 : vector<8x128xf32>
    %cst_62 = arith.constant 1.000000e+00 : f32
    %180 = vector.broadcast %cst_62 : f32 to vector<8x128xf32>
    %181 = arith.addf %180, %179 : vector<8x128xf32>
    %182 = arith.divf %180, %181 : vector<8x128xf32>
    %183 = vector.extract_strided_slice %164 {offsets = [0, 256], sizes = [8, 128], strides = [1, 1]} : vector<8x384xf32> to vector<8x128xf32>
    %184 = vector.extract_strided_slice %166 {offsets = [0, 256], sizes = [8, 128], strides = [1, 1]} : vector<8x384xf32> to vector<8x128xf32>
    %185 = arith.addf %184, %16 : vector<8x128xf32>
    %186 = arith.mulf %174, %185 : vector<8x128xf32>
    %187 = arith.addf %183, %186 : vector<8x128xf32>
    %188 = math.tanh %187 : vector<8x128xf32>
    %cst_63 = arith.constant 1.000000e+00 : f32
    %189 = vector.broadcast %cst_63 : f32 to vector<8x128xf32>
    %190 = arith.subf %189, %182 : vector<8x128xf32>
    %191 = arith.mulf %190, %188 : vector<8x128xf32>
    %192 = arith.mulf %182, %157 : vector<8x128xf32>
    %193 = arith.addf %191, %192 : vector<8x128xf32>
    %194 = arith.index_cast %c4_i32 : i32 to index
    %c0_64 = arith.constant 0 : index
    %c0_65 = arith.constant 0 : index
    %195 = vector.load %arg12[%194, %c0_64, %c0_65] : memref<8x8x128xf32, #tpu.memory_space<vmem>>, vector<1x8x128xf32>
    %196 = vector.shape_cast %195 : vector<1x8x128xf32> to vector<8x128xf32>
    %197 = vector.shape_cast %193 : vector<8x128xf32> to vector<1x8x128xf32>
    tpu.vector_store %arg12[%194, %c0_64, %c0_65], %197 {strides = array<i32>} : memref<8x8x128xf32, #tpu.memory_space<vmem>>, vector<1x8x128xf32>,
    %c5_i32 = arith.constant 5 : i32
    %198 = arith.index_cast %c5_i32 : i32 to index
    %c0_66 = arith.constant 0 : index
    %c0_67 = arith.constant 0 : index
    %199 = vector.load %arg11[%198, %c0_66, %c0_67] : memref<8x8x384xf32, #tpu.memory_space<vmem>>, vector<1x8x384xf32>
    %200 = vector.shape_cast %199 : vector<1x8x384xf32> to vector<8x384xf32>
    %c0_68 = arith.constant 0 : index
    %c0_69 = arith.constant 0 : index
    %201 = vector.load %arg5[%c0_68, %c0_69] : memref<128x384xf32, #tpu.memory_space<vmem>>, vector<128x384xf32>
    %cst_70 = arith.constant dense<0.000000e+00> : vector<8x384xf32>
    %202 = tpu.matmul %193, %201, %cst_70 {dimension_numbers = #tpu.dot_dimension_numbers<[1], [0], [0], [1], [0, 0, 1, 1], [], []>} : vector<8x128xf32>, vector<128x384xf32>, vector<8x384xf32> -> vector<8x384xf32>
    %203 = vector.extract_strided_slice %200 {offsets = [0, 0], sizes = [8, 128], strides = [1, 1]} : vector<8x384xf32> to vector<8x128xf32>
    %204 = vector.extract_strided_slice %202 {offsets = [0, 0], sizes = [8, 128], strides = [1, 1]} : vector<8x384xf32> to vector<8x128xf32>
    %205 = arith.addf %203, %204 : vector<8x128xf32>
    %206 = arith.negf %205 : vector<8x128xf32>
    %207 = math.exp %206 : vector<8x128xf32>
    %cst_71 = arith.constant 1.000000e+00 : f32
    %208 = vector.broadcast %cst_71 : f32 to vector<8x128xf32>
    %209 = arith.addf %208, %207 : vector<8x128xf32>
    %210 = arith.divf %208, %209 : vector<8x128xf32>
    %211 = vector.extract_strided_slice %200 {offsets = [0, 128], sizes = [8, 128], strides = [1, 1]} : vector<8x384xf32> to vector<8x128xf32>
    %212 = vector.extract_strided_slice %202 {offsets = [0, 128], sizes = [8, 128], strides = [1, 1]} : vector<8x384xf32> to vector<8x128xf32>
    %213 = arith.addf %211, %212 : vector<8x128xf32>
    %214 = arith.negf %213 : vector<8x128xf32>
    %215 = math.exp %214 : vector<8x128xf32>
    %cst_72 = arith.constant 1.000000e+00 : f32
    %216 = vector.broadcast %cst_72 : f32 to vector<8x128xf32>
    %217 = arith.addf %216, %215 : vector<8x128xf32>
    %218 = arith.divf %216, %217 : vector<8x128xf32>
    %219 = vector.extract_strided_slice %200 {offsets = [0, 256], sizes = [8, 128], strides = [1, 1]} : vector<8x384xf32> to vector<8x128xf32>
    %220 = vector.extract_strided_slice %202 {offsets = [0, 256], sizes = [8, 128], strides = [1, 1]} : vector<8x384xf32> to vector<8x128xf32>
    %221 = arith.addf %220, %16 : vector<8x128xf32>
    %222 = arith.mulf %210, %221 : vector<8x128xf32>
    %223 = arith.addf %219, %222 : vector<8x128xf32>
    %224 = math.tanh %223 : vector<8x128xf32>
    %cst_73 = arith.constant 1.000000e+00 : f32
    %225 = vector.broadcast %cst_73 : f32 to vector<8x128xf32>
    %226 = arith.subf %225, %218 : vector<8x128xf32>
    %227 = arith.mulf %226, %224 : vector<8x128xf32>
    %228 = arith.mulf %218, %193 : vector<8x128xf32>
    %229 = arith.addf %227, %228 : vector<8x128xf32>
    %230 = arith.index_cast %c5_i32 : i32 to index
    %c0_74 = arith.constant 0 : index
    %c0_75 = arith.constant 0 : index
    %231 = vector.load %arg12[%230, %c0_74, %c0_75] : memref<8x8x128xf32, #tpu.memory_space<vmem>>, vector<1x8x128xf32>
    %232 = vector.shape_cast %231 : vector<1x8x128xf32> to vector<8x128xf32>
    %233 = vector.shape_cast %229 : vector<8x128xf32> to vector<1x8x128xf32>
    tpu.vector_store %arg12[%230, %c0_74, %c0_75], %233 {strides = array<i32>} : memref<8x8x128xf32, #tpu.memory_space<vmem>>, vector<1x8x128xf32>,
    %c6_i32 = arith.constant 6 : i32
    %234 = arith.index_cast %c6_i32 : i32 to index
    %c0_76 = arith.constant 0 : index
    %c0_77 = arith.constant 0 : index
    %235 = vector.load %arg11[%234, %c0_76, %c0_77] : memref<8x8x384xf32, #tpu.memory_space<vmem>>, vector<1x8x384xf32>
    %236 = vector.shape_cast %235 : vector<1x8x384xf32> to vector<8x384xf32>
    %c0_78 = arith.constant 0 : index
    %c0_79 = arith.constant 0 : index
    %237 = vector.load %arg5[%c0_78, %c0_79] : memref<128x384xf32, #tpu.memory_space<vmem>>, vector<128x384xf32>
    %cst_80 = arith.constant dense<0.000000e+00> : vector<8x384xf32>
    %238 = tpu.matmul %229, %237, %cst_80 {dimension_numbers = #tpu.dot_dimension_numbers<[1], [0], [0], [1], [0, 0, 1, 1], [], []>} : vector<8x128xf32>, vector<128x384xf32>, vector<8x384xf32> -> vector<8x384xf32>
    %239 = vector.extract_strided_slice %236 {offsets = [0, 0], sizes = [8, 128], strides = [1, 1]} : vector<8x384xf32> to vector<8x128xf32>
    %240 = vector.extract_strided_slice %238 {offsets = [0, 0], sizes = [8, 128], strides = [1, 1]} : vector<8x384xf32> to vector<8x128xf32>
    %241 = arith.addf %239, %240 : vector<8x128xf32>
    %242 = arith.negf %241 : vector<8x128xf32>
    %243 = math.exp %242 : vector<8x128xf32>
    %cst_81 = arith.constant 1.000000e+00 : f32
    %244 = vector.broadcast %cst_81 : f32 to vector<8x128xf32>
    %245 = arith.addf %244, %243 : vector<8x128xf32>
    %246 = arith.divf %244, %245 : vector<8x128xf32>
    %247 = vector.extract_strided_slice %236 {offsets = [0, 128], sizes = [8, 128], strides = [1, 1]} : vector<8x384xf32> to vector<8x128xf32>
    %248 = vector.extract_strided_slice %238 {offsets = [0, 128], sizes = [8, 128], strides = [1, 1]} : vector<8x384xf32> to vector<8x128xf32>
    %249 = arith.addf %247, %248 : vector<8x128xf32>
    %250 = arith.negf %249 : vector<8x128xf32>
    %251 = math.exp %250 : vector<8x128xf32>
    %cst_82 = arith.constant 1.000000e+00 : f32
    %252 = vector.broadcast %cst_82 : f32 to vector<8x128xf32>
    %253 = arith.addf %252, %251 : vector<8x128xf32>
    %254 = arith.divf %252, %253 : vector<8x128xf32>
    %255 = vector.extract_strided_slice %236 {offsets = [0, 256], sizes = [8, 128], strides = [1, 1]} : vector<8x384xf32> to vector<8x128xf32>
    %256 = vector.extract_strided_slice %238 {offsets = [0, 256], sizes = [8, 128], strides = [1, 1]} : vector<8x384xf32> to vector<8x128xf32>
    %257 = arith.addf %256, %16 : vector<8x128xf32>
    %258 = arith.mulf %246, %257 : vector<8x128xf32>
    %259 = arith.addf %255, %258 : vector<8x128xf32>
    %260 = math.tanh %259 : vector<8x128xf32>
    %cst_83 = arith.constant 1.000000e+00 : f32
    %261 = vector.broadcast %cst_83 : f32 to vector<8x128xf32>
    %262 = arith.subf %261, %254 : vector<8x128xf32>
    %263 = arith.mulf %262, %260 : vector<8x128xf32>
    %264 = arith.mulf %254, %229 : vector<8x128xf32>
    %265 = arith.addf %263, %264 : vector<8x128xf32>
    %266 = arith.index_cast %c6_i32 : i32 to index
    %c0_84 = arith.constant 0 : index
    %c0_85 = arith.constant 0 : index
    %267 = vector.load %arg12[%266, %c0_84, %c0_85] : memref<8x8x128xf32, #tpu.memory_space<vmem>>, vector<1x8x128xf32>
    %268 = vector.shape_cast %267 : vector<1x8x128xf32> to vector<8x128xf32>
    %269 = vector.shape_cast %265 : vector<8x128xf32> to vector<1x8x128xf32>
    tpu.vector_store %arg12[%266, %c0_84, %c0_85], %269 {strides = array<i32>} : memref<8x8x128xf32, #tpu.memory_space<vmem>>, vector<1x8x128xf32>,
    %c7_i32 = arith.constant 7 : i32
    %270 = arith.index_cast %c7_i32 : i32 to index
    %c0_86 = arith.constant 0 : index
    %c0_87 = arith.constant 0 : index
    %271 = vector.load %arg11[%270, %c0_86, %c0_87] : memref<8x8x384xf32, #tpu.memory_space<vmem>>, vector<1x8x384xf32>
    %272 = vector.shape_cast %271 : vector<1x8x384xf32> to vector<8x384xf32>
    %c0_88 = arith.constant 0 : index
    %c0_89 = arith.constant 0 : index
    %273 = vector.load %arg5[%c0_88, %c0_89] : memref<128x384xf32, #tpu.memory_space<vmem>>, vector<128x384xf32>
    %cst_90 = arith.constant dense<0.000000e+00> : vector<8x384xf32>
    %274 = tpu.matmul %265, %273, %cst_90 {dimension_numbers = #tpu.dot_dimension_numbers<[1], [0], [0], [1], [0, 0, 1, 1], [], []>} : vector<8x128xf32>, vector<128x384xf32>, vector<8x384xf32> -> vector<8x384xf32>
    %275 = vector.extract_strided_slice %272 {offsets = [0, 0], sizes = [8, 128], strides = [1, 1]} : vector<8x384xf32> to vector<8x128xf32>
    %276 = vector.extract_strided_slice %274 {offsets = [0, 0], sizes = [8, 128], strides = [1, 1]} : vector<8x384xf32> to vector<8x128xf32>
    %277 = arith.addf %275, %276 : vector<8x128xf32>
    %278 = arith.negf %277 : vector<8x128xf32>
    %279 = math.exp %278 : vector<8x128xf32>
    %cst_91 = arith.constant 1.000000e+00 : f32
    %280 = vector.broadcast %cst_91 : f32 to vector<8x128xf32>
    %281 = arith.addf %280, %279 : vector<8x128xf32>
    %282 = arith.divf %280, %281 : vector<8x128xf32>
    %283 = vector.extract_strided_slice %272 {offsets = [0, 128], sizes = [8, 128], strides = [1, 1]} : vector<8x384xf32> to vector<8x128xf32>
    %284 = vector.extract_strided_slice %274 {offsets = [0, 128], sizes = [8, 128], strides = [1, 1]} : vector<8x384xf32> to vector<8x128xf32>
    %285 = arith.addf %283, %284 : vector<8x128xf32>
    %286 = arith.negf %285 : vector<8x128xf32>
    %287 = math.exp %286 : vector<8x128xf32>
    %cst_92 = arith.constant 1.000000e+00 : f32
    %288 = vector.broadcast %cst_92 : f32 to vector<8x128xf32>
    %289 = arith.addf %288, %287 : vector<8x128xf32>
    %290 = arith.divf %288, %289 : vector<8x128xf32>
    %291 = vector.extract_strided_slice %272 {offsets = [0, 256], sizes = [8, 128], strides = [1, 1]} : vector<8x384xf32> to vector<8x128xf32>
    %292 = vector.extract_strided_slice %274 {offsets = [0, 256], sizes = [8, 128], strides = [1, 1]} : vector<8x384xf32> to vector<8x128xf32>
    %293 = arith.addf %292, %16 : vector<8x128xf32>
    %294 = arith.mulf %282, %293 : vector<8x128xf32>
    %295 = arith.addf %291, %294 : vector<8x128xf32>
    %296 = math.tanh %295 : vector<8x128xf32>
    %cst_93 = arith.constant 1.000000e+00 : f32
    %297 = vector.broadcast %cst_93 : f32 to vector<8x128xf32>
    %298 = arith.subf %297, %290 : vector<8x128xf32>
    %299 = arith.mulf %298, %296 : vector<8x128xf32>
    %300 = arith.mulf %290, %265 : vector<8x128xf32>
    %301 = arith.addf %299, %300 : vector<8x128xf32>
    %302 = arith.index_cast %c7_i32 : i32 to index
    %c0_94 = arith.constant 0 : index
    %c0_95 = arith.constant 0 : index
    %303 = vector.load %arg12[%302, %c0_94, %c0_95] : memref<8x8x128xf32, #tpu.memory_space<vmem>>, vector<1x8x128xf32>
    %304 = vector.shape_cast %303 : vector<1x8x128xf32> to vector<8x128xf32>
    %305 = vector.shape_cast %301 : vector<8x128xf32> to vector<1x8x128xf32>
    tpu.vector_store %arg12[%302, %c0_94, %c0_95], %305 {strides = array<i32>} : memref<8x8x128xf32, #tpu.memory_space<vmem>>, vector<1x8x128xf32>,
    %c8_i32 = arith.constant 8 : i32
    %c0_96 = arith.constant 0 : index
    %c0_97 = arith.constant 0 : index
    %c0_98 = arith.constant 0 : index
    %306 = vector.load %arg12[%c0_96, %c0_97, %c0_98] : memref<8x8x128xf32, #tpu.memory_space<vmem>>, vector<8x8x128xf32>
    %c0_99 = arith.constant 0 : index
    %c0_100 = arith.constant 0 : index
    %307 = vector.load %arg7[%c0_99, %c0_100] : memref<1x128xf32, #tpu.memory_space<vmem>>, vector<1x128xf32>
    %308 = vector.shape_cast %307 : vector<1x128xf32> to vector<1x1x128xf32>
    %309 = vector.broadcast %308 : vector<1x1x128xf32> to vector<8x8x128xf32>
    %310 = arith.mulf %306, %309 : vector<8x8x128xf32>
    %cst_101 = arith.constant dense<0.000000e+00> : vector<8x8xf32>
    %311 = vector.multi_reduction <add>, %310, %cst_101 [2] : vector<8x8x128xf32> to vector<8x8xf32>
    %312 = vector.shape_cast %311 : vector<8x8xf32> to vector<8x8x1xf32>
    %cst_102 = arith.constant dense<0xFF800000> : vector<8x1xf32>
    %313 = vector.multi_reduction <maximumf>, %312, %cst_102 [0] : vector<8x8x1xf32> to vector<8x1xf32>
    %314 = vector.shape_cast %313 : vector<8x1xf32> to vector<1x8x1xf32>
    %315 = vector.broadcast %314 : vector<1x8x1xf32> to vector<8x8x1xf32>
    %316 = arith.subf %312, %315 : vector<8x8x1xf32>
    %317 = math.exp %316 : vector<8x8x1xf32>
    %cst_103 = arith.constant dense<0.000000e+00> : vector<8x1xf32>
    %318 = vector.multi_reduction <add>, %317, %cst_103 [0] : vector<8x8x1xf32> to vector<8x1xf32>
    %319 = vector.shape_cast %318 : vector<8x1xf32> to vector<1x8x1xf32>
    %320 = vector.broadcast %319 : vector<1x8x1xf32> to vector<8x8x1xf32>
    %321 = arith.divf %317, %320 : vector<8x8x1xf32>
    %322 = vector.broadcast %321 : vector<8x8x1xf32> to vector<8x8x128xf32>
    %323 = arith.mulf %306, %322 : vector<8x8x128xf32>
    %cst_104 = arith.constant dense<0.000000e+00> : vector<8x128xf32>
    %324 = vector.multi_reduction <add>, %323, %cst_104 [0] : vector<8x8x128xf32> to vector<8x128xf32>
    %c0_105 = arith.constant 0 : index
    %c0_106 = arith.constant 0 : index
    %325 = vector.load %arg8[%c0_105, %c0_106] : memref<128x128xf32, #tpu.memory_space<vmem>>, vector<128x128xf32>
    %cst_107 = arith.constant dense<0.000000e+00> : vector<8x128xf32>
    %326 = tpu.matmul %324, %325, %cst_107 {dimension_numbers = #tpu.dot_dimension_numbers<[1], [0], [0], [1], [0, 0, 1, 1], [], []>} : vector<8x128xf32>, vector<128x128xf32>, vector<8x128xf32> -> vector<8x128xf32>
    %c0_108 = arith.constant 0 : index
    %c0_109 = arith.constant 0 : index
    %327 = vector.load %arg9[%c0_108, %c0_109] : memref<1x128xf32, #tpu.memory_space<vmem>>, vector<1x128xf32>
    %328 = vector.broadcast %327 : vector<1x128xf32> to vector<8x128xf32>
    %329 = arith.addf %326, %328 : vector<8x128xf32>
    %c0_110 = arith.constant 0 : index
    %c0_111 = arith.constant 0 : index
    %330 = vector.load %arg10[%c0_110, %c0_111] : memref<8x128xf32, #tpu.memory_space<vmem>>, vector<8x128xf32>
    tpu.vector_store %arg10[%c0_110, %c0_111], %329 {strides = array<i32>} : memref<8x128xf32, #tpu.memory_space<vmem>>, vector<8x128xf32>,
    return
  }
}

</mosaic_0001>

<bundles_post_ra>
// kernel: gru_bayes_forward.1
= control target key start
LH: loop header
LB: loop body
LE: loop exit
PB: predicated region body
PF: predicated region fallthrough
CT: control target
= control target key end

     0   :  { %v4644_v3 = vmov 0.0   ;;  %vm55_vm0 = vcmask 261120   ;;  %vm3116_vm1 = vmmov 0   ;;  %s4631_s3 = inlined_call_operand.vmem [shape: f32[32,384], index: 3, kind: input, shape index: {}]   ;;  %s4632_s0 = inlined_call_operand.vmem [shape: f32[64,32], index: 0, kind: input, shape index: {}]   ;;  %s4633_s5 = inlined_call_operand.vmem [shape: f32[128,384], index: 5, kind: input, shape index: {}]   ;;  %s4634_s2 = inlined_call_operand.vmem [shape: f32[32,384], index: 2, kind: input, shape index: {}]   ;;  %s4635_s1 = inlined_call_operand.vmem [shape: f32[8,32], index: 1, kind: input, shape index: {}]   ;;  %s4636_s4 = inlined_call_operand.vmem [shape: f32[1,384], index: 4, kind: input, shape index: {}]   ;;  %s4637_s6 = inlined_call_operand.vmem [shape: f32[1,128], index: 6, kind: input, shape index: {}]   ;;  %s4638_s7 = inlined_call_operand.vmem [shape: f32[1,128], index: 7, kind: input, shape index: {}]   ;;  %s4639_s8 = inlined_call_operand.vmem [shape: f32[128,128], index: 8, kind: input, shape index: {}]   ;;  %s4640_s9 = inlined_call_operand.vmem [shape: f32[1,128], index: 9, kind: input, shape index: {}]   ;;  %s4641_s10 = inlined_call_operand.vmem [shape: f32[8,128], index: 10, kind: output, shape index: {}]  }
   0x1   :  { %v53_v0 = vld [vmem:[%s4631_s3 + $0x50] sm:$0xff]  ;;  %v54_v1 = vld [vmem:[%s4631_s3 + $0x58] sm:$0xff]  ;;  %v52_v2 = vld [vmem:[%s4631_s3 + $0x48] sm:$0xff]  ;;  %144 = vmatprep.mubr.f32.mxu0 %v4644_v3 }
   0x2   :  { %104 = vmatprep.subr.mxu0 %v53_v0  ;;  %2667 = vmatprep.subr.mxu1 %v54_v1  ;;  %v50_v4 = vld [vmem:[%s4631_s3 + $0x38] sm:$0xff]  ;;  %v51_v5 = vld [vmem:[%s4631_s3 + $0x40] sm:$0xff]  ;;  %v49_v6 = vld [vmem:[%s4631_s3 + $0x30] sm:$0xff] }
   0x3   :  { %105 = vmatpush1.msra.mxu0 %v52_v2  ;;  %2668 = vmatpush3.msra.mxu1 %v54_v1  ;;  %v47_v7 = vld [vmem:[%s4631_s3 + $0x20] sm:$0xff]  ;;  %v48_v8 = vld [vmem:[%s4631_s3 + $0x28] sm:$0xff]  ;;  %v46_v9 = vld [vmem:[%s4631_s3 + $0x18] sm:$0xff] }
   0x4   :  { %106 = vmatprep.subr.mxu0 %v50_v4  ;;  %2669 = vmatprep.subr.mxu1 %v51_v5  ;;  %v44_v10 = vld [vmem:[%s4631_s3 + $0x8] sm:$0xff]  ;;  %v45_v11 = vld [vmem:[%s4631_s3 + $0x10] sm:$0xff]  ;;  %v43_v12 = vld [vmem:[%s4631_s3] sm:$0xff] }
   0x5   :  { %107 = vmatpush1.msra.mxu0 %v49_v6  ;;  %2670 = vmatpush3.msra.mxu1 %v51_v5  ;;  %v35_v13 = vld [vmem:[%s4632_s0] sm:$0xff]  ;;  %v36_v14 = vld [vmem:[%s4632_s0 + $0x8] sm:$0xff]  ;;  %v3218_v15 = vld [vmem:[%s4633_s5 + $0x170] sm:$0xff] }
   0x6   :  { %108 = vmatprep.subr.mxu0 %v47_v7  ;;  %2671 = vmatprep.subr.mxu1 %v48_v8  ;;  %v3223_v16 = vld [vmem:[%s4633_s5 + $0x168] sm:$0xff]  ;;  %v3230_v17 = vld [vmem:[%s4633_s5 + $0x158] sm:$0xff]  ;;  %v37_v18 = vld [vmem:[%s4632_s0 + $0x10] sm:$0xff] }
   0x7   :  { %109 = vmatpush1.msra.mxu0 %v46_v9  ;;  %2672 = vmatpush3.msra.mxu1 %v48_v8  ;;  %v3240_v19 = vld [vmem:[%s4633_s5 + $0x150] sm:$0xff]  ;;  %v38_v21 = vld [vmem:[%s4632_s0 + $0x18] sm:$0xff]  ;;  %v3255_v22 = vld [vmem:[%s4633_s5 + $0x140] sm:$0xff] }
   0x8   :  { %110 = vmatprep.subr.mxu0 %v44_v10  ;;  %2673 = vmatprep.subr.mxu1 %v45_v11  ;;  %v309_v20 = vld [vmem:[%s4634_s2 + $0x50] sm:$0xff]  ;;  %v3261_v23 = vld [vmem:[%s4633_s5 + $0x138] sm:$0xff]  ;;  %v39_v24 = vld [vmem:[%s4632_s0 + $0x20] sm:$0xff] }
   0x9   :  { %111 = vmatpush1.msra.mxu0 %v43_v12  ;;  %2674 = vmatpush3.msra.mxu1 %v45_v11  ;;  %v3271_v25 = vld [vmem:[%s4633_s5 + $0x128] sm:$0xff]  ;;  %v3281_v27 = vld [vmem:[%s4633_s5 + $0x120] sm:$0xff]  ;;  %v3293_v29 = vld [vmem:[%s4633_s5 + $0x110] sm:$0xff] }
   0xa   :  { %2675 = vmatprep.mubr.msk.f32.mxu1 %vm55_vm0, %v35_v13  ;;  %2460 = vmatmul.mubr.msk.f32.vlgmr.msra.gmra.mxu0 %vm55_vm0, %v35_v13  ;;  %v308_v26 = vld [vmem:[%s4634_s2 + $0x48] sm:$0xff]  ;;  %v306_v30 = vld [vmem:[%s4634_s2 + $0x38] sm:$0xff]  ;;  %v305_v32 = vld [vmem:[%s4634_s2 + $0x30] sm:$0xff] }
   0xb   :  { %2676 = vmatmul.mubr.msk.f32.vlgmr.msra.gmra.mxu1 %vm55_vm0, %v36_v14  ;;  %578 = vmatprep.subr.mxu0 %v3218_v15  ;;  %v3286_v28 = vld [vmem:[%s4632_s0 + $0x28] sm:$0xff]  ;;  %v3313_v33 = vld [vmem:[%s4633_s5 + $0xf8] sm:$0xff]  ;;  %v3320_v34 = vld [vmem:[%s4632_s0 + $0x30] sm:$0xff] }
   0xc   :  { %579 = vmatpush1.msra.mxu0 %v3223_v16  ;;  %150 = vmatprep.mubr.f32.mxu0 %v4644_v3  ;;  %v3302_v31 = vld [vmem:[%s4633_s5 + $0x108] sm:$0xff]  ;;  %v303_v35 = vld [vmem:[%s4634_s2 + $0x20] sm:$0xff]  ;;  %v3329_v36 = vld [vmem:[%s4633_s5 + $0xf0] sm:$0xff] }
   0xd   :  { %580 = vmatprep.subr.mxu0 %v3230_v17  ;;  %2678 = vmatprep.mubr.msk.f32.mxu1 %vm55_vm0, %v37_v18  ;;  %v3335_v37 = vld [vmem:[%s4632_s0 + $0x38] sm:$0xff]  ;;  %v3346_v39 = vld [vmem:[%s4633_s5 + $0xe0] sm:$0xff]  ;;  %v300_v40 = vld [vmem:[%s4634_s2 + $0x8] sm:$0xff] }
   0xe   :  { %581 = vmatpush1.msra.mxu0 %v3240_v19  ;;  %355 = vmatprep.subr.mxu1 %v309_v20  ;;  %v302_v38 = vld [vmem:[%s4634_s2 + $0x18] sm:$0xff]  ;;  %v299_v42 = vld [vmem:[%s4634_s2] sm:$0xff]  ;;  %v3366_v43 = vld [vmem:[%s4633_s5 + $0xc8] sm:$0xff] }
   0xf   :  { %2461 = vmatmul.mubr.msk.f32.gmra.mxu0 %vm55_vm0, %v36_v14  ;;  %2679 = vmatmul.mubr.msk.f32.gmra.mxu1 %vm55_vm0, %v38_v21  ;;  %v3355_v41 = vld [vmem:[%s4633_s5 + $0xd8] sm:$0xff]  ;;  %v3373_v44 = vld [vmem:[%s4633_s5 + $0xc0] sm:$0xff]  ;;  %v3387_v47 = vld [vmem:[%s4633_s5 + $0xb0] sm:$0xff] }
  0x10   :  { %582 = vmatprep.subr.mxu0 %v3255_v22  ;;  %156 = vmatprep.mubr.f32.mxu0 %v4644_v3  ;;  %v298_v45 = vld [vmem:[%s4635_s1] sm:$0xff]  ;;  %v310_v46 = vld [vmem:[%s4634_s2 + $0x58] sm:$0xff]  ;;  %v3394_v48 = vld [vmem:[%s4633_s5 + $0xa8] sm:$0xff] }
  0x11   :  { %583 = vmatpush1.msra.mxu0 %v3261_v23  ;;  %2681 = vmatprep.mubr.msk.f32.mxu1 %vm55_vm0, %v39_v24  ;;  %v307_v49 = vld [vmem:[%s4634_s2 + $0x40] sm:$0xff]  ;;  %v3404_v50 = vld [vmem:[%s4633_s5 + $0x98] sm:$0xff]  ;;  %v3412_v51 = vld [vmem:[%s4633_s5 + $0x90] sm:$0xff] }
  0x12   :  { %584 = vmatprep.subr.mxu0 %v3271_v25  ;;  %356 = vmatpush1.msra.mxu1 %v308_v26  ;;  %v304_v52 = vld [vmem:[%s4634_s2 + $0x28] sm:$0xff]  ;;  %v3421_v53 = vld [vmem:[%s4633_s5 + $0x80] sm:$0xff]  ;;  %v3428_v54 = vld [vmem:[%s4633_s5 + $0x78] sm:$0xff] }
  0x13   :  { %585 = vmatpush1.msra.mxu0 %v3281_v27  ;;  %2682 = vmatmul.mubr.msk.f32.gmra.mxu1 %vm55_vm0, %v3286_v28  ;;  %4682 = vst [vmem:[#allocation4_spill] sm:$0xff] %v3421_v53  ;;  %4683 = vst [vmem:[#allocation5_spill] sm:$0xff] %v3428_v54  ;;  %v301_v55 = vld [vmem:[%s4634_s2 + $0x10] sm:$0xff]  ;;  %v3440_v56 = vld [vmem:[%s4633_s5 + $0x68] sm:$0xff] }
  0x14   :  { %2462 = vmatmul.mubr.msk.f32.gmra.mxu0 %vm55_vm0, %v37_v18  ;;  %586 = vmatprep.subr.mxu0 %v3293_v29  ;;  %4684 = vst [vmem:[#allocation6_spill] sm:$0xff] %v3440_v56  ;;  %v3447_v57 = vld [vmem:[%s4633_s5 + $0x60] sm:$0xff]  ;;  %v3454_v58 = vld [vmem:[%s4633_s5 + $0x50] sm:$0xff]  ;;  %v3461_v59 = vld [vmem:[%s4633_s5 + $0x48] sm:$0xff] }
  0x15   :  { %357 = vmatprep.subr.mxu1 %v306_v30  ;;  %587 = vmatpush1.msra.mxu0 %v3302_v31  ;;  %4685 = vst [vmem:[#allocation7_spill] sm:$0xff] %v3447_v57  ;;  %4686 = vst [vmem:[#allocation8_spill] sm:$0xff] %v3454_v58  ;;  %v3468_v60 = vld [vmem:[%s4633_s5 + $0x38] sm:$0xff]  ;;  %v3476_v61 = vld [vmem:[%s4633_s5 + $0x30] sm:$0xff] }
  0x16   :  { %358 = vmatpush1.msra.mxu1 %v305_v32  ;;  %588 = vmatprep.subr.mxu0 %v3313_v33  ;;  %4687 = vst [vmem:[#allocation9_spill] sm:$0xff] %v3461_v59  ;;  %4688 = vst [vmem:[#allocation10_spill] sm:$0xff] %v3468_v60  ;;  %v3481_v62 = vld [vmem:[%s4633_s5 + $0x178] sm:$0xff]  ;;  %v3488_v63 = vld [vmem:[%s4633_s5 + $0x20] sm:$0xff] }
  0x17   :  { %162 = vmatprep.mubr.f32.mxu0 %v4644_v3  ;;  %2684 = vmatprep.mubr.msk.f32.mxu1 %vm55_vm0, %v3320_v34  ;;  %4689 = vst [vmem:[#allocation11_spill] sm:$0xff] %v3476_v61  ;;  %4690 = vst [vmem:[#allocation12_spill] sm:$0xff] %v3488_v63  ;;  %v3494_v0 = vld [vmem:[%s4633_s5 + $0x18] sm:$0xff]  ;;  %v3501_v1 = vld [vmem:[%s4633_s5 + $0x8] sm:$0xff] }
  0x18   :  { %359 = vmatprep.subr.mxu1 %v303_v35  ;;  %589 = vmatpush1.msra.mxu0 %v3329_v36  ;;  %4691 = vst [vmem:[#allocation13_spill] sm:$0xff] %v3494_v0  ;;  %4692 = vst [vmem:[#allocation14_spill] sm:$0xff] %v3501_v1  ;;  %v3510_v2 = vld [vmem:[%s4633_s5] sm:$0xff]  ;;  %v3524_v5 = vld [vmem:[%s4633_s5 + $0x148] sm:$0xff]  ;;  %v313_v35 = vlaneseq }
  0x19   :  { %2463 = vmatmul.mubr.msk.f32.gmra.mxu0 %vm55_vm0, %v38_v21  ;;  %2685 = vmatmul.mubr.msk.f32.gmra.mxu1 %vm55_vm0, %v3335_v37  ;;  %4693 = vst [vmem:[#allocation15_spill] sm:$0xff] %v3510_v2  ;;  %v3515_v4 = vld [vmem:[%s4633_s5 + $0x160] sm:$0xff]  ;;  %v3533_v6 = vld [vmem:[%s4633_s5 + $0x130] sm:$0xff]  ;;  %v3542_v7 = vld [vmem:[%s4633_s5 + $0x118] sm:$0xff] }
  0x1a   :  { %360 = vmatpush1.msra.mxu1 %v302_v38  ;;  %590 = vmatprep.subr.mxu0 %v3346_v39  ;;  %v3551_v8 = vld [vmem:[%s4633_s5 + $0x100] sm:$0xff]  ;;  %v3560_v9 = vld [vmem:[%s4633_s5 + $0xe8] sm:$0xff]  ;;  %v3569_v10 = vld [vmem:[%s4633_s5 + $0xd0] sm:$0xff] }
  0x1b   :  { %361 = vmatprep.subr.mxu1 %v300_v40  ;;  %591 = vmatpush1.msra.mxu0 %v3355_v41  ;;  %v3578_v11 = vld [vmem:[%s4633_s5 + $0xb8] sm:$0xff]  ;;  %v3587_v12 = vld [vmem:[%s4633_s5 + $0xa0] sm:$0xff]  ;;  %v3596_v13 = vld [vmem:[%s4633_s5 + $0x88] sm:$0xff] }
  0x1c   :  { %362 = vmatpush1.msra.mxu1 %v299_v42  ;;  %592 = vmatprep.subr.mxu0 %v3366_v43  ;;  %4694 = vst [vmem:[#allocation16_spill] sm:$0xff] %v3596_v13  ;;  %v3605_v14 = vld [vmem:[%s4633_s5 + $0x70] sm:$0xff]  ;;  %v3614_v18 = vld [vmem:[%s4633_s5 + $0x58] sm:$0xff]  ;;  %v3623_v20 = vld [vmem:[%s4633_s5 + $0x40] sm:$0xff] }
  0x1d   :  { %168 = vmatprep.mubr.f32.mxu0 %v4644_v3  ;;  %395 = vmatprep.mubr.f32.mxu1 %v4644_v3  ;;  %4695 = vst [vmem:[#allocation17_spill] sm:$0xff] %v3605_v14  ;;  %4696 = vst [vmem:[#allocation18_spill] sm:$0xff] %v3614_v18  ;;  %v3632_v21 = vld [vmem:[%s4633_s5 + $0x28] sm:$0xff] }
  0x1e   :  { %2687 = vmatprep.subr.mxu1 %v4644_v3  ;;  %593 = vmatpush1.msra.mxu0 %v3373_v44  ;;  %4697 = vst [vmem:[#allocation19_spill] sm:$0xff] %v3623_v20  ;;  %4698 = vst [vmem:[#allocation20_spill] sm:$0xff] %v3632_v21 }
  0x1f   :  { %2464 = vmatmul.mubr.msk.f32.gmra.mxu0 %vm55_vm0, %v39_v24  ;;  %2476 = vmatmul.mubr.msk.f32.vlgmr.msra.gmra.mxu1 %vm55_vm0, %v298_v45  ;;  %v3641_v24 = vld [vmem:[%s4633_s5 + $0x10] sm:$0xff] }
  0x20   :  { %2688 = vmatpush3.msra.mxu1 %v310_v46  ;;  %594 = vmatprep.subr.mxu0 %v3387_v47  ;;  %4699 = vst [vmem:[#allocation21_spill] sm:$0xff] %v3641_v24 }
  0x21   :  { %2689 = vmatprep.subr.mxu1 %v4644_v3  ;;  %595 = vmatpush1.msra.mxu0 %v3394_v48 }
  0x22   :  { %2690 = vmatpush3.msra.mxu1 %v307_v49  ;;  %596 = vmatprep.subr.mxu0 %v3404_v50 }
  0x23   :  { %174 = vmatprep.mubr.f32.mxu0 %v4644_v3  ;;  %2691 = vmatprep.subr.mxu1 %v4644_v3 }
  0x24   :  { %597 = vmatpush1.msra.mxu0 %v3412_v51  ;;  %2692 = vmatpush3.msra.mxu1 %v304_v52 }
  0x25   :  { %2465 = vmatmul.mubr.msk.f32.gmra.mxu0 %vm55_vm0, %v3286_v28  ;;  %598 = vmatprep.subr.mxu0 %v3421_v53 }
  0x26   :  { %2693 = vmatprep.subr.mxu1 %v4644_v3  ;;  %599 = vmatpush1.msra.mxu0 %v3428_v54 }
  0x27   :  { %2694 = vmatpush3.msra.mxu1 %v301_v55  ;;  %2695 = vmatprep.mubr.msk.f32.mxu1 %vm3116_vm1, %v4644_v3 }
  0x28   :  { %600 = vmatprep.subr.mxu0 %v3440_v56  ;;  %180 = vmatprep.mubr.f32.mxu0 %v4644_v3 }
  0x29   :  { %2696 = vmatmul.mubr.msk.f32.vlgmr.msra.gmra.mxu1 %vm55_vm0, %v298_v45  ;;  %601 = vmatpush1.msra.mxu0 %v3447_v57  ;;  %v314_v45 = vshrl.u32 %v313_v35, 7 }
  0x2a   :  { %2466 = vmatmul.mubr.msk.f32.gmra.mxu0 %vm55_vm0, %v3320_v34  ;;  %602 = vmatprep.subr.mxu0 %v3454_v58 }
  0x2b   :  { %603 = vmatpush1.msra.mxu0 %v3461_v59  ;;  %186 = vmatprep.mubr.f32.mxu0 %v4644_v3  ;;  %v315_v52 = vsub.s32 0, %v314_v45 }
  0x2c   :  { %604 = vmatprep.subr.mxu0 %v3468_v60  ;;  %2698 = vmatprep.subr.mxu1 %v4644_v3 }
  0x2d   :  { %605 = vmatpush1.msra.mxu0 %v3476_v61  ;;  %2699 = vmatpush3.msra.mxu1 %v3481_v62 }
  0x2e   :  { %2467 = vmatmul.mubr.msk.f32.gmra.mxu0 %vm55_vm0, %v3335_v37  ;;  %606 = vmatprep.subr.mxu0 %v3488_v63 }
  0x2f   :  { %607 = vmatpush1.msra.mxu0 %v3494_v0  ;;  %642 = vmatprep.mubr.f32.mxu0 %v4644_v3 }
  0x30   :  { %608 = vmatprep.subr.mxu0 %v3501_v1  ;;  %2700 = vmatprep.subr.mxu1 %v4644_v3 }
  0x31   :  { %609 = vmatpush1.msra.mxu0 %v3510_v2  ;;  %2701 = vmatpush3.msra.mxu1 %v3515_v4 }
  0x32   :  { %643 = vmatmul.mubr.f32.vlgmr.msra.gmra.mxu0 %v4644_v3  ;;  %2702 = vmatprep.subr.mxu1 %v4644_v3 }
  0x33   :  { %2703 = vmatpush3.msra.mxu1 %v3524_v5  ;;  %2730 = vmatprep.mubr.msk.f32.mxu1 %vm3116_vm1, %v4644_v3 }
  0x34   :  { %2704 = vmatprep.subr.mxu1 %v4644_v3  ;;  %794 = vmatprep.subr.mxu0 %v3218_v15 }
  0x35   :  { %2705 = vmatpush3.msra.mxu1 %v3533_v6  ;;  %795 = vmatpush1.msra.mxu0 %v3223_v16 }
  0x36   :  { %2706 = vmatprep.subr.mxu1 %v4644_v3  ;;  %796 = vmatprep.subr.mxu0 %v3230_v17 }
  0x37   :  { %2707 = vmatpush3.msra.mxu1 %v3542_v7  ;;  %797 = vmatpush1.msra.mxu0 %v3240_v19 }
  0x38   :  { %2708 = vmatprep.subr.mxu1 %v4644_v3  ;;  %798 = vmatprep.subr.mxu0 %v3255_v22 }
  0x39   :  { %2709 = vmatpush3.msra.mxu1 %v3551_v8  ;;  %799 = vmatpush1.msra.mxu0 %v3261_v23 }
  0x3a   :  { %2710 = vmatprep.subr.mxu1 %v4644_v3  ;;  %800 = vmatprep.subr.mxu0 %v3271_v25 }
  0x3b   :  { %2711 = vmatpush3.msra.mxu1 %v3560_v9  ;;  %801 = vmatpush1.msra.mxu0 %v3281_v27 }
  0x3c   :  { %2712 = vmatprep.subr.mxu1 %v4644_v3  ;;  %802 = vmatprep.subr.mxu0 %v3293_v29 }
  0x3d   :  { %2713 = vmatpush3.msra.mxu1 %v3569_v10  ;;  %803 = vmatpush1.msra.mxu0 %v3302_v31 }
  0x3e   :  { %2714 = vmatprep.subr.mxu1 %v4644_v3  ;;  %804 = vmatprep.subr.mxu0 %v3313_v33 }
  0x3f   :  { %2715 = vmatpush3.msra.mxu1 %v3578_v11  ;;  %805 = vmatpush1.msra.mxu0 %v3329_v36 }
  0x40   :  { %2716 = vmatprep.subr.mxu1 %v4644_v3  ;;  %806 = vmatprep.subr.mxu0 %v3346_v39 }
  0x41   :  { %2717 = vmatpush3.msra.mxu1 %v3587_v12  ;;  %807 = vmatpush1.msra.mxu0 %v3355_v41 }
  0x42   :  { %2718 = vmatprep.subr.mxu1 %v4644_v3  ;;  %808 = vmatprep.subr.mxu0 %v3366_v43 }
  0x43   :  { %2719 = vmatpush3.msra.mxu1 %v3596_v13  ;;  %809 = vmatpush1.msra.mxu0 %v3373_v44 }
  0x44   :  { %2720 = vmatprep.subr.mxu1 %v4644_v3  ;;  %810 = vmatprep.subr.mxu0 %v3387_v47 }
  0x45   :  { %2721 = vmatpush3.msra.mxu1 %v3605_v14  ;;  %811 = vmatpush1.msra.mxu0 %v3394_v48 }
  0x46   :  { %2722 = vmatprep.subr.mxu1 %v4644_v3  ;;  %812 = vmatprep.subr.mxu0 %v3404_v50 }
  0x47   :  { %2723 = vmatpush3.msra.mxu1 %v3614_v18  ;;  %813 = vmatpush1.msra.mxu0 %v3412_v51 }
  0x48   :  { %2724 = vmatprep.subr.mxu1 %v4644_v3  ;;  %814 = vmatprep.subr.mxu0 %v3421_v53 }
  0x49   :  { %2725 = vmatpush3.msra.mxu1 %v3623_v20  ;;  %815 = vmatpush1.msra.mxu0 %v3428_v54 }
  0x4a   :  { %2726 = vmatprep.subr.mxu1 %v4644_v3  ;;  %816 = vmatprep.subr.mxu0 %v3440_v56 }
  0x4b   :  { %2727 = vmatpush3.msra.mxu1 %v3632_v21  ;;  %817 = vmatpush1.msra.mxu0 %v3447_v57 }
  0x4c   :  { %2728 = vmatprep.subr.mxu1 %v4644_v3  ;;  %818 = vmatprep.subr.mxu0 %v3454_v58  ;;  %v323_v58 = vsub.s32 2, %v314_v45 }
  0x4d   :  { %2729 = vmatpush3.msra.mxu1 %v3641_v24  ;;  %819 = vmatpush1.msra.mxu0 %v3461_v59 }
  0x4e   :  { %2731 = vmatmul.mubr.f32.vlgmr.msra.gmra.mxu1 %v4644_v3  ;;  %2733 = vmatprep.subr.mxu1 %v4644_v3 }
  0x4f   :  { %2734 = vmatpush3.msra.mxu1 %v3481_v62  ;;  %820 = vmatprep.subr.mxu0 %v3468_v60 }
  0x50   :  { %2735 = vmatprep.subr.mxu1 %v4644_v3  ;;  %821 = vmatpush1.msra.mxu0 %v3476_v61 }
  0x51   :  { %2736 = vmatpush3.msra.mxu1 %v3515_v4  ;;  %822 = vmatprep.subr.mxu0 %v3488_v63 }
  0x52   :  { %2737 = vmatprep.subr.mxu1 %v4644_v3  ;;  %823 = vmatpush1.msra.mxu0 %v3494_v0 }
  0x53   :  { %2738 = vmatpush3.msra.mxu1 %v3524_v5  ;;  %824 = vmatprep.subr.mxu0 %v3501_v1 }
  0x54   :  { %2739 = vmatprep.subr.mxu1 %v4644_v3  ;;  %825 = vmatpush1.msra.mxu0 %v3510_v2  ;;  %v319_v2 = vsub.s32 1, %v314_v45 }
  0x55   :  { %2740 = vmatpush3.msra.mxu1 %v3533_v6  ;;  %858 = vmatprep.mubr.f32.mxu0 %v4644_v3 }
  0x56   :  { %2741 = vmatprep.subr.mxu1 %v4644_v3  ;;  %2765 = vmatprep.mubr.msk.f32.mxu1 %vm3116_vm1, %v4644_v3 }
  0x57   :  { %2742 = vmatpush3.msra.mxu1 %v3542_v7  ;;  %1011 = vmatprep.subr.mxu0 %v3218_v15 }
  0x58   :  { %2743 = vmatprep.subr.mxu1 %v4644_v3 }
  0x59   :  { %2744 = vmatpush3.msra.mxu1 %v3551_v8 }
  0x5a   :  { %2745 = vmatprep.subr.mxu1 %v4644_v3 }
  0x5b   :  { %2746 = vmatpush3.msra.mxu1 %v3560_v9 }
  0x5c   :  { %2747 = vmatprep.subr.mxu1 %v4644_v3 }
  0x5d   :  { %2748 = vmatpush3.msra.mxu1 %v3569_v10 }
  0x5e   :  { %2749 = vmatprep.subr.mxu1 %v4644_v3 }
  0x5f   :  { %2750 = vmatpush3.msra.mxu1 %v3578_v11 }
  0x60   :  { %2751 = vmatprep.subr.mxu1 %v4644_v3 }
  0x61   :  { %2752 = vmatpush3.msra.mxu1 %v3587_v12 }
  0x62   :  { %2753 = vmatprep.subr.mxu1 %v4644_v3 }
  0x63   :  { %2754 = vmatpush3.msra.mxu1 %v3596_v13 }
  0x64   :  { %2755 = vmatprep.subr.mxu1 %v4644_v3 }
  0x65   :  { %2756 = vmatpush3.msra.mxu1 %v3605_v14 }
  0x66   :  { %2757 = vmatprep.subr.mxu1 %v4644_v3 }
  0x67   :  { %2758 = vmatpush3.msra.mxu1 %v3614_v18 }
  0x68   :  { %2759 = vmatprep.subr.mxu1 %v4644_v3 }
  0x69   :  { %2760 = vmatpush3.msra.mxu1 %v3623_v20 }
  0x6a   :  { %2761 = vmatprep.subr.mxu1 %v4644_v3 }
  0x6b   :  { %2762 = vmatpush3.msra.mxu1 %v3632_v21 }
  0x6c   :  { %2763 = vmatprep.subr.mxu1 %v4644_v3 }
  0x6d   :  { %2764 = vmatpush3.msra.mxu1 %v3641_v24 }
  0x6e   :  { %2768 = vmatprep.subr.mxu1 %v4644_v3  ;;  %v311_v3 = vld [vmem:[%s4636_s4] sm:$0x7] }
  0x6f   :  { %v316_v0 = vrot.slane %v311_v3, %v315_v52  ;;  %v320_v63 = vrot.slane %v311_v3, %v319_v2 }
  0xca   :  { %v146_v15 = vpop.f32.mrf.mxu0 }
  0xcb   :  { %v2677_v26 = vpop.f32.mrf.mxu1 }
  0xcc   :  { %v3694_v28 = vpop.f32.mrf.mxu0 }
  0xcd   :  { %v3696_v30 = vpop.f32.mrf.mxu1 }
  0xcf   :  { %v152_v32 = vpop.f32.mrf.mxu0  ;;  %v2680_v34 = vpop.f32.mrf.mxu1 }
  0xd1   :  { %v154_v37 = vpop.f32.mrf.mxu0  ;;  %v269_v38 = vpop.f32.mrf.mxu1 }
  0xd3   :  { %v2683_v40 = vpop.f32.mrf.mxu1 }
  0xd4   :  { %v158_v42 = vpop.f32.mrf.mxu0 }
  0xd5   :  { %v279_v46 = vpop.f32.mrf.mxu1 }
  0xd6   :  { %v160_v49 = vpop.f32.mrf.mxu0 }
  0xd9   :  { %v164_v55 = vpop.f32.mrf.mxu0  ;;  %v2686_v24 = vpop.f32.mrf.mxu1 }
  0xdb   :  { %v166_v1 = vpop.f32.mrf.mxu0  ;;  %v289_v21 = vpop.f32.mrf.mxu1 }
  0xdf   :  { %v170_v20 = vpop.f32.mrf.mxu0  ;;  %v397_v61 = vpop.f32.mrf.mxu1 }
  0xe0   :  { %v398_v60 = vadd.f32 %v397_v61, %v316_v0 }
  0xe1   :  { %v172_v18 = vpop.f32.mrf.mxu0  ;;  %v399_v59 = vpop.f32.mrf.mxu1 }
  0xe2   :  { %v400_v35 = vadd.f32 %v399_v59, %v320_v63  ;;  %v3701_v14 = vadd.f32 %v398_v60, %v152_v32  ;;  %v3703_v57 = vadd.f32 %v398_v60, %v158_v42  ;;  %v3705_v56 = vadd.f32 %v398_v60, %v164_v55 }
  0xe3   :  { %v3707_v13 = vadd.f32 %v398_v60, %v170_v20  ;;  %v324_v59 = vrot.slane %v311_v3, %v323_v58 }
  0xe4   :  { %v3709_v54 = vadd.f32 %v400_v35, %v154_v37  ;;  %v3711_v53 = vadd.f32 %v400_v35, %v160_v49  ;;  %v3713_v2 = vadd.f32 %v400_v35, %v166_v1  ;;  %v3715_v61 = vadd.f32 %v400_v35, %v172_v18 }
  0xe5   :  { %4700 = vst [vmem:[#allocation22_spill] sm:$0xff] %v3707_v13  ;;  %v176_v52 = vpop.f32.mrf.mxu0 }
  0xe6   :  { %4701 = vst [vmem:[#allocation23_spill] sm:$0xff] %v3713_v2  ;;  %4702 = vst [vmem:[#allocation24_spill] sm:$0xff] %v3715_v61  ;;  %v3717_v0 = vadd.f32 %v398_v60, %v176_v52 }
  0xe7   :  { %v178_v63 = vpop.f32.mrf.mxu0 }
  0xe8   :  { %4703 = vst [vmem:[#allocation25_spill] sm:$0xff] %v3717_v0  ;;  %v3719_v32 = vadd.f32 %v400_v35, %v178_v63 }
  0xe9   :  { %v468_v42 = vpop.f32.mrf.mxu1 }
  0xea   :  { %4704 = vst [vmem:[#allocation26_spill] sm:$0xff] %v3719_v32  ;;  %v469_v45 = vadd.f32 %v468_v42, %v324_v59  ;;  %v182_v55 = vpop.f32.mrf.mxu0 }
  0xeb   :  { %v3721_v20 = vadd.f32 %v398_v60, %v182_v55  ;;  %v2697_v37 = vpop.f32.mrf.mxu1 }
  0xec   :  { %v184_v13 = vpop.f32.mrf.mxu0  ;;  %v3723_v49 = vadd.f32 %v2677_v26, %v469_v45  ;;  %v3725_v1 = vadd.f32 %v469_v45, %v269_v38  ;;  %v3727_v2 = vadd.f32 %v2680_v34, %v469_v45  ;;  %v3731_v52 = vadd.f32 %v469_v45, %v279_v46 }
  0xed   :  { %4705 = vst [vmem:[#allocation27_spill] sm:$0xff] %v3721_v20  ;;  %v3729_v18 = vadd.f32 %v400_v35, %v184_v13  ;;  %v3733_v3 = vadd.f32 %v2683_v40, %v469_v45  ;;  %v3735_v58 = vadd.f32 %v469_v45, %v289_v21  ;;  %v3737_v63 = vadd.f32 %v2686_v24, %v469_v45  ;;  %v4741_v32 = vld [vmem:[#allocation23_spill] sm:$0xff] }
  0xee   :  { %4707 = vst [vmem:[#allocation29_spill] sm:$0xff] %v3731_v52  ;;  %v188_v59 = vpop.f32.mrf.mxu0  ;;  %v472_v38 = vadd.f32 %v398_v60, %v146_v15  ;;  %v473_v46 = vadd.f32 %v400_v35, %v3694_v28  ;;  %v474_v28 = vadd.f32 %v469_v45, %v3696_v30  ;;  %v4714_v45 = vmov 0.0  }
  0xef   :  { %4706 = vst [vmem:[#allocation28_spill] sm:$0xff] %v3729_v18  ;;  %4708 = vst [vmem:[#allocation30_spill] sm:$0xff] %v3733_v3  ;;  %v3739_v42 = vadd.f32 %v398_v60, %v188_v59  ;;  %v3747_v59 = vld [vmem:[%s4637_s6] ss:$0 sm:$0xff] }
  0xf0   :  { %4709 = vst [vmem:[#allocation31_spill] sm:$0xff] %v3735_v58  ;;  %4710 = vst [vmem:[#allocation32_spill] sm:$0xff] %v3737_v63  ;;  %v190_v55 = vpop.f32.mrf.mxu0 }
  0xf1   :  { %4711 = vst [vmem:[#allocation33_spill] sm:$0xff] %v3739_v42  ;;  %v3741_v26 = vadd.f32 %v400_v35, %v190_v55 }
  0xf2   :  { %v644_v37 = vpop.f32.mrf.mxu0 }
  0xf3   :  { %4712 = vst [vmem:[#allocation34_spill] sm:$0xff] %v3741_v26  ;;  %v719_v34 = vadd.f32 %v644_v37, %v472_v38 }
  0xf4   :  { %v646_v13 = vpop.f32.mrf.mxu0 }
  0xf5   :  { %v2479_v20 = vmul.f32 -1.442695, %v719_v34  ;;  %v726_v40 = vadd.f32 %v646_v13, %v473_v46 }
  0xf7   :  { %3015 = vpow2.f32 %v2479_v20  ;;  %v2480_v18 = vmul.f32 -1.442695, %v726_v40  ;;  %v3754_v40 = vld [vmem:[%s4638_s7] ss:$0 sm:$0xff] }
  0xf9   :  { %3017 = vpow2.f32 %v2480_v18 }
 0x104   :  { %v3016_v21 = vpop.eup %3015 }
 0x105   :  { %v723_v58 = vadd.f32 1.0, %v3016_v21 }
 0x106   :  { %v3018_v24 = vpop.eup %3017 }
 0x107   :  { %3019 = vrcp.f32 %v723_v58  ;;  %v730_v55 = vadd.f32 1.0, %v3018_v24 }
 0x109   :  { %3021 = vrcp.f32 %v730_v55 }
 0x10e   :  { %v715_v60 = vpop.f32.mrf.mxu1 }
 0x10f   :  { %v733_v38 = vadd.f32 %v3747_v59, %v715_v60 }
 0x110   :  { %v2732_v15 = vpop.f32.mrf.mxu1 }
 0x114   :  { %v3020_v20 = vpop.eup %3019 }
 0x115   :  { %v734_v35 = vmul.f32 %v3020_v20, %v733_v38 }
 0x116   :  { %v3022_v37 = vpop.eup %3021 }
 0x117   :  { %v735_v18 = vadd.f32 %v734_v35, %v474_v28  ;;  %v737_v58 = vsub.f32 1.0, %v3022_v37  ;;  %v739_v46 = vmul.f32 0.0, %v3022_v37 }
 0x119   :  { %3023 = vtanh.f32 %v735_v18 }
 0x126   :  { %v3024_v34 = vpop.eup %3023 }
 0x127   :  { %v738_v13 = vmul.f32 %v3024_v34, %v737_v58 }
 0x129   :  { %v3756_v21 = vadd.f32 %v739_v46, %v738_v13 }
 0x12b   :  { %4713 = vst [vmem:[#allocation35_spill] sm:$0xff] %v3756_v21  ;;  %859 = vmatmul.mubr.f32.vlgmr.msra.gmra.mxu0 %v3756_v21  ;;  %2766 = vmatmul.mubr.f32.vlgmr.msra.gmra.mxu1 %v3756_v21  ;;  %v2276_v30 = vmul.f32 %v3754_v40, %v3756_v21 }
 0x12c   :  { %1012 = vmatpush1.msra.mxu0 %v3223_v16  ;;  %2769 = vmatpush3.msra.mxu1 %v3481_v62  ;;  %v4715_v16 = vld [vmem:[#allocation4_spill] sm:$0xff] }
 0x12d   :  { %2284 = vadd.xlane.f32.xlu0 %v2276_v30  ;;  %1013 = vmatprep.subr.mxu0 %v3230_v17  ;;  %v4716_v17 = vld [vmem:[#allocation5_spill] sm:$0xff] }
 0x12e   :  { %2770 = vmatprep.subr.mxu1 %v4714_v45  ;;  %1014 = vmatpush1.msra.mxu0 %v3240_v19  ;;  %v4717_v19 = vld [vmem:[#allocation16_spill] sm:$0xff] }
 0x12f   :  { %2771 = vmatpush3.msra.mxu1 %v3515_v4  ;;  %1015 = vmatprep.subr.mxu0 %v3255_v22  ;;  %v4718_v22 = vld [vmem:[#allocation6_spill] sm:$0xff] }
 0x130   :  { %2772 = vmatprep.subr.mxu1 %v4714_v45  ;;  %1016 = vmatpush1.msra.mxu0 %v3261_v23  ;;  %v4719_v23 = vld [vmem:[#allocation7_spill] sm:$0xff] }
 0x131   :  { %2773 = vmatpush3.msra.mxu1 %v3524_v5  ;;  %1017 = vmatprep.subr.mxu0 %v3271_v25  ;;  %v4720_v25 = vld [vmem:[#allocation17_spill] sm:$0xff] }
 0x132   :  { %2774 = vmatprep.subr.mxu1 %v4714_v45  ;;  %1018 = vmatpush1.msra.mxu0 %v3281_v27  ;;  %v4721_v27 = vld [vmem:[#allocation8_spill] sm:$0xff] }
 0x133   :  { %2775 = vmatpush3.msra.mxu1 %v3533_v6  ;;  %1019 = vmatprep.subr.mxu0 %v3293_v29  ;;  %v4722_v29 = vld [vmem:[#allocation9_spill] sm:$0xff] }
 0x134   :  { %2776 = vmatprep.subr.mxu1 %v4714_v45  ;;  %1020 = vmatpush1.msra.mxu0 %v3302_v31  ;;  %v4723_v31 = vld [vmem:[#allocation18_spill] sm:$0xff] }
 0x135   :  { %2777 = vmatpush3.msra.mxu1 %v3542_v7  ;;  %1021 = vmatprep.subr.mxu0 %v3313_v33  ;;  %v4724_v33 = vld [vmem:[#allocation10_spill] sm:$0xff] }
 0x136   :  { %2778 = vmatprep.subr.mxu1 %v4714_v45  ;;  %1022 = vmatpush1.msra.mxu0 %v3329_v36  ;;  %v4725_v36 = vld [vmem:[#allocation11_spill] sm:$0xff] }
 0x137   :  { %2779 = vmatpush3.msra.mxu1 %v3551_v8  ;;  %1023 = vmatprep.subr.mxu0 %v3346_v39  ;;  %v4726_v39 = vld [vmem:[#allocation19_spill] sm:$0xff] }
 0x138   :  { %2780 = vmatprep.subr.mxu1 %v4714_v45  ;;  %1024 = vmatpush1.msra.mxu0 %v3355_v41  ;;  %v4727_v41 = vld [vmem:[#allocation12_spill] sm:$0xff] }
 0x139   :  { %2781 = vmatpush3.msra.mxu1 %v3560_v9  ;;  %1025 = vmatprep.subr.mxu0 %v3366_v43  ;;  %v4728_v43 = vld [vmem:[#allocation13_spill] sm:$0xff] }
 0x13a   :  { %2782 = vmatprep.subr.mxu1 %v4714_v45  ;;  %1026 = vmatpush1.msra.mxu0 %v3373_v44  ;;  %v4729_v44 = vld [vmem:[#allocation20_spill] sm:$0xff] }
 0x13b   :  { %2783 = vmatpush3.msra.mxu1 %v3569_v10  ;;  %1027 = vmatprep.subr.mxu0 %v3387_v47  ;;  %v4730_v47 = vld [vmem:[#allocation14_spill] sm:$0xff] }
 0x13c   :  { %2784 = vmatprep.subr.mxu1 %v4714_v45  ;;  %1028 = vmatpush1.msra.mxu0 %v3394_v48  ;;  %v4731_v48 = vld [vmem:[#allocation15_spill] sm:$0xff] }
 0x13d   :  { %2785 = vmatpush3.msra.mxu1 %v3578_v11  ;;  %1029 = vmatprep.subr.mxu0 %v3404_v50  ;;  %v4732_v50 = vld [vmem:[#allocation21_spill] sm:$0xff] }
 0x13e   :  { %2786 = vmatprep.subr.mxu1 %v4714_v45  ;;  %1030 = vmatpush1.msra.mxu0 %v3412_v51 }
 0x13f   :  { %2787 = vmatpush3.msra.mxu1 %v3587_v12  ;;  %1031 = vmatprep.subr.mxu0 %v4715_v16 }
 0x140   :  { %2788 = vmatprep.subr.mxu1 %v4714_v45  ;;  %1032 = vmatpush1.msra.mxu0 %v4716_v17 }
 0x141   :  { %2789 = vmatpush3.msra.mxu1 %v4717_v19  ;;  %1033 = vmatprep.subr.mxu0 %v4718_v22 }
 0x142   :  { %2790 = vmatprep.subr.mxu1 %v4714_v45  ;;  %1034 = vmatpush1.msra.mxu0 %v4719_v23 }
 0x143   :  { %2791 = vmatpush3.msra.mxu1 %v4720_v25  ;;  %1035 = vmatprep.subr.mxu0 %v4721_v27 }
 0x144   :  { %2792 = vmatprep.subr.mxu1 %v4714_v45  ;;  %1036 = vmatpush1.msra.mxu0 %v4722_v29  ;;  %v3955_v29 = vld [vmem:[%s4633_s5 + $0xd8] sm:$0xff] }
 0x145   :  { %2793 = vmatpush3.msra.mxu1 %v4723_v31  ;;  %1037 = vmatprep.subr.mxu0 %v4724_v33  ;;  %v3967_v33 = vld [vmem:[%s4633_s5 + $0xc0] sm:$0xff] }
 0x146   :  { %2794 = vmatprep.subr.mxu1 %v4714_v45  ;;  %1038 = vmatpush1.msra.mxu0 %v4725_v36  ;;  %v3972_v36 = vld [vmem:[%s4633_s5 + $0xb0] sm:$0xff] }
 0x147   :  { %2795 = vmatpush3.msra.mxu1 %v4726_v39  ;;  %1039 = vmatprep.subr.mxu0 %v4727_v41  ;;  %v3983_v41 = vld [vmem:[%s4633_s5 + $0x98] sm:$0xff] }
 0x148   :  { %2796 = vmatprep.subr.mxu1 %v4714_v45  ;;  %1040 = vmatpush1.msra.mxu0 %v4728_v43  ;;  %v3989_v43 = vld [vmem:[%s4633_s5 + $0x90] sm:$0xff] }
 0x149   :  { %2797 = vmatpush3.msra.mxu1 %v4729_v44  ;;  %1041 = vmatprep.subr.mxu0 %v4730_v47  ;;  %v4001_v47 = vld [vmem:[%s4633_s5 + $0x78] sm:$0xff] }
 0x14a   :  { %2798 = vmatprep.subr.mxu1 %v4714_v45  ;;  %1042 = vmatpush1.msra.mxu0 %v4731_v48  ;;  %v4007_v48 = vld [vmem:[%s4633_s5 + $0x68] sm:$0xff] }
 0x14b   :  { %1075 = vmatprep.mubr.f32.mxu0 %v4714_v45  ;;  %2799 = vmatpush3.msra.mxu1 %v4732_v50 }
 0x14c   :  { %2800 = vmatprep.mubr.msk.f32.mxu1 %vm3116_vm1, %v4714_v45  ;;  %2803 = vmatprep.subr.mxu1 %v4714_v45 }
 0x1eb   :  { %v860_v51 = vpop.f32.mrf.mxu0  ;;  %v931_v24 = vpop.f32.mrf.mxu1 }
 0x1ec   :  { %v935_v60 = vadd.f32 %v860_v51, %v3701_v14  ;;  %v949_v34 = vadd.f32 %v3747_v59, %v931_v24  ;;  %v4019_v51 = vld [vmem:[%s4633_s5 + $0x50] sm:$0xff]  ;;  %v4025_v24 = vld [vmem:[%s4633_s5 + $0x48] sm:$0xff] }
 0x1ed   :  { %v2767_v15 = vpop.f32.mrf.mxu1  ;;  %v862_v38 = vpop.f32.mrf.mxu0 }
 0x1ee   :  { %v2481_v55 = vmul.f32 -1.442695, %v935_v60  ;;  %v942_v20 = vadd.f32 %v862_v38, %v3709_v54  ;;  %v4031_v60 = vld [vmem:[%s4633_s5 + $0x38] sm:$0xff]  ;;  %v4037_v15 = vld [vmem:[%s4633_s5 + $0x30] sm:$0xff] }
 0x1ef   :  { %v4049_v38 = vld [vmem:[%s4633_s5 + $0x18] sm:$0xff] }
 0x1f0   :  { %3025 = vpow2.f32 %v2481_v55  ;;  %v2482_v28 = vmul.f32 -1.442695, %v942_v20  ;;  %v4043_v55 = vld [vmem:[%s4633_s5 + $0x20] sm:$0xff]  ;;  %4735 = vst [vmem:[#allocation16_spill] sm:$0xff] %v4049_v38  ;;  %v4055_v20 = vld [vmem:[%s4633_s5 + $0x8] sm:$0xff] }
 0x1f1   :  { %4736 = vst [vmem:[#allocation6_spill] sm:$0xff] %v4055_v20 }
 0x1f2   :  { %3027 = vpow2.f32 %v2482_v28  ;;  %v4061_v28 = vld [vmem:[%s4633_s5] sm:$0xff] }
 0x1f3   :  { %4737 = vst [vmem:[#allocation7_spill] sm:$0xff] %v4061_v28 }
 0x1fd   :  { %v3026_v35 = vpop.eup %3025 }
 0x1fe   :  { %v939_v18 = vadd.f32 1.0, %v3026_v35 }
 0x1ff   :  { %v3028_v37 = vpop.eup %3027 }
 0x200   :  { %3029 = vrcp.f32 %v939_v18  ;;  %v946_v58 = vadd.f32 1.0, %v3028_v37 }
 0x202   :  { %3031 = vrcp.f32 %v946_v58 }
 0x20d   :  { %v3030_v13 = vpop.eup %3029 }
 0x20e   :  { %v950_v46 = vmul.f32 %v3030_v13, %v949_v34 }
 0x20f   :  { %v3032_v30 = vpop.eup %3031 }
 0x210   :  { %v951_v14 = vadd.f32 %v950_v46, %v3723_v49  ;;  %v953_v16 = vsub.f32 1.0, %v3032_v30  ;;  %v955_v54 = vmul.f32 %v3032_v30, %v3756_v21  ;;  %v3937_v49 = vld [vmem:[%s4633_s5 + $0xf8] sm:$0xff] }
 0x212   :  { %3033 = vtanh.f32 %v951_v14 }
 0x21f   :  { %v3034_v17 = vpop.eup %3033 }
 0x220   :  { %v954_v22 = vmul.f32 %v3034_v17, %v953_v16 }
 0x222   :  { %v3833_v23 = vadd.f32 %v955_v54, %v954_v22 }
 0x224   :  { %4733 = vst [vmem:[#allocation4_spill] sm:$0xff] %v3833_v23  ;;  %1076 = vmatmul.mubr.f32.vlgmr.msra.gmra.mxu0 %v3833_v23  ;;  %2801 = vmatmul.mubr.f32.vlgmr.msra.gmra.mxu1 %v3833_v23  ;;  %v2277_v27 = vmul.f32 %v3754_v40, %v3833_v23 }
 0x225   :  { %2804 = vmatpush3.msra.mxu1 %v3481_v62  ;;  %1292 = vmatprep.mubr.f32.mxu0 %v4714_v45  ;;  %v3877_v62 = vld [vmem:[%s4633_s5 + $0x170] sm:$0xff] }
 0x226   :  { %2286 = vadd.xlane.f32.xlu0 %v2277_v27  ;;  %2805 = vmatprep.subr.mxu1 %v4714_v45  ;;  %4734 = vst [vmem:[#allocation5_spill] sm:$0xff] %v3877_v62 }
 0x227   :  { %2806 = vmatpush3.msra.mxu1 %v3515_v4  ;;  %2835 = vmatprep.mubr.msk.f32.mxu1 %vm3116_vm1, %v4714_v45  ;;  %v3883_v4 = vld [vmem:[%s4633_s5 + $0x168] sm:$0xff] }
 0x228   :  { %2807 = vmatprep.subr.mxu1 %v4714_v45  ;;  %1228 = vmatprep.subr.mxu0 %v3877_v62 }
 0x229   :  { %2808 = vmatpush3.msra.mxu1 %v3524_v5  ;;  %1229 = vmatpush1.msra.mxu0 %v3883_v4  ;;  %v3889_v5 = vld [vmem:[%s4633_s5 + $0x158] sm:$0xff] }
 0x22a   :  { %2809 = vmatprep.subr.mxu1 %v4714_v45  ;;  %1230 = vmatprep.subr.mxu0 %v3889_v5 }
 0x22b   :  { %2810 = vmatpush3.msra.mxu1 %v3533_v6  ;;  %v3895_v6 = vld [vmem:[%s4633_s5 + $0x150] sm:$0xff] }
 0x22c   :  { %2811 = vmatprep.subr.mxu1 %v4714_v45  ;;  %1231 = vmatpush1.msra.mxu0 %v3895_v6 }
 0x22d   :  { %2812 = vmatpush3.msra.mxu1 %v3542_v7  ;;  %v3901_v7 = vld [vmem:[%s4633_s5 + $0x140] sm:$0xff] }
 0x22e   :  { %2813 = vmatprep.subr.mxu1 %v4714_v45  ;;  %1232 = vmatprep.subr.mxu0 %v3901_v7 }
 0x22f   :  { %2814 = vmatpush3.msra.mxu1 %v3551_v8  ;;  %v3907_v8 = vld [vmem:[%s4633_s5 + $0x138] sm:$0xff] }
 0x230   :  { %2815 = vmatprep.subr.mxu1 %v4714_v45  ;;  %1233 = vmatpush1.msra.mxu0 %v3907_v8 }
 0x231   :  { %2816 = vmatpush3.msra.mxu1 %v3560_v9  ;;  %v3913_v9 = vld [vmem:[%s4633_s5 + $0x128] sm:$0xff] }
 0x232   :  { %2817 = vmatprep.subr.mxu1 %v4714_v45  ;;  %1234 = vmatprep.subr.mxu0 %v3913_v9 }
 0x233   :  { %2818 = vmatpush3.msra.mxu1 %v3569_v10  ;;  %v3919_v10 = vld [vmem:[%s4633_s5 + $0x120] sm:$0xff] }
 0x234   :  { %2819 = vmatprep.subr.mxu1 %v4714_v45  ;;  %1235 = vmatpush1.msra.mxu0 %v3919_v10 }
 0x235   :  { %2820 = vmatpush3.msra.mxu1 %v3578_v11  ;;  %v3925_v11 = vld [vmem:[%s4633_s5 + $0x110] sm:$0xff] }
 0x236   :  { %2821 = vmatprep.subr.mxu1 %v4714_v45  ;;  %1236 = vmatprep.subr.mxu0 %v3925_v11 }
 0x237   :  { %2822 = vmatpush3.msra.mxu1 %v3587_v12  ;;  %v3931_v12 = vld [vmem:[%s4633_s5 + $0x108] sm:$0xff] }
 0x238   :  { %2823 = vmatprep.subr.mxu1 %v4714_v45  ;;  %1237 = vmatpush1.msra.mxu0 %v3931_v12 }
 0x239   :  { %2824 = vmatpush3.msra.mxu1 %v4717_v19  ;;  %1238 = vmatprep.subr.mxu0 %v3937_v49  ;;  %v3943_v19 = vld [vmem:[%s4633_s5 + $0xf0] sm:$0xff] }
 0x23a   :  { %2825 = vmatprep.subr.mxu1 %v4714_v45  ;;  %1239 = vmatpush1.msra.mxu0 %v3943_v19 }
 0x23b   :  { %2826 = vmatpush3.msra.mxu1 %v4720_v25  ;;  %v3949_v25 = vld [vmem:[%s4633_s5 + $0xe0] sm:$0xff] }
 0x23c   :  { %2827 = vmatprep.subr.mxu1 %v4714_v45  ;;  %1240 = vmatprep.subr.mxu0 %v3949_v25 }
 0x23d   :  { %2828 = vmatpush3.msra.mxu1 %v4723_v31  ;;  %1241 = vmatpush1.msra.mxu0 %v3955_v29  ;;  %v3961_v31 = vld [vmem:[%s4633_s5 + $0xc8] sm:$0xff] }
 0x23e   :  { %2829 = vmatprep.subr.mxu1 %v4714_v45  ;;  %1242 = vmatprep.subr.mxu0 %v3961_v31 }
 0x23f   :  { %2830 = vmatpush3.msra.mxu1 %v4726_v39  ;;  %v3977_v39 = vld [vmem:[%s4633_s5 + $0xa8] sm:$0xff]  ;;  %1243 = vmatpush1.msra.mxu0 %v3967_v33 }
 0x240   :  { %2831 = vmatprep.subr.mxu1 %v4714_v45  ;;  %1244 = vmatprep.subr.mxu0 %v3972_v36 }
 0x241   :  { %2832 = vmatpush3.msra.mxu1 %v4729_v44  ;;  %1245 = vmatpush1.msra.mxu0 %v3977_v39  ;;  %v3995_v44 = vld [vmem:[%s4633_s5 + $0x80] sm:$0xff] }
 0x242   :  { %2833 = vmatprep.subr.mxu1 %v4714_v45  ;;  %1246 = vmatprep.subr.mxu0 %v3983_v41 }
 0x243   :  { %2834 = vmatpush3.msra.mxu1 %v4732_v50  ;;  %1247 = vmatpush1.msra.mxu0 %v3989_v43  ;;  %v4013_v50 = vld [vmem:[%s4633_s5 + $0x60] sm:$0xff] }
 0x244   :  { %2838 = vmatprep.subr.mxu1 %v4714_v45  ;;  %1248 = vmatprep.subr.mxu0 %v3995_v44 }
 0x245   :  { %1249 = vmatpush1.msra.mxu0 %v4001_v47 }
 0x246   :  { %1250 = vmatprep.subr.mxu0 %v4007_v48 }
 0x247   :  { %1251 = vmatpush1.msra.mxu0 %v4013_v50 }
 0x248   :  { %1252 = vmatprep.subr.mxu0 %v4019_v51 }
 0x249   :  { %1253 = vmatpush1.msra.mxu0 %v4025_v24 }
 0x24a   :  { %1254 = vmatprep.subr.mxu0 %v4031_v60 }
 0x24b   :  { %1255 = vmatpush1.msra.mxu0 %v4037_v15 }
 0x24c   :  { %1256 = vmatprep.subr.mxu0 %v4043_v55 }
 0x24d   :  { %1257 = vmatpush1.msra.mxu0 %v4049_v38 }
 0x24e   :  { %1258 = vmatprep.subr.mxu0 %v4055_v20 }
 0x24f   :  { %1259 = vmatpush1.msra.mxu0 %v4061_v28 }
 0x250   :  { %1445 = vmatprep.subr.mxu0 %v3877_v62 }
 0x2e4   :  { %v1077_v35 = vpop.f32.mrf.mxu0  ;;  %v1148_v18 = vpop.f32.mrf.mxu1 }
 0x2e5   :  { %v1152_v37 = vadd.f32 %v1077_v35, %v3703_v57  ;;  %v1166_v54 = vadd.f32 %v3747_v59, %v1148_v18 }
 0x2e6   :  { %v2802_v58 = vpop.f32.mrf.mxu1  ;;  %v1079_v13 = vpop.f32.mrf.mxu0 }
 0x2e7   :  { %v2483_v34 = vmul.f32 -1.442695, %v1152_v37  ;;  %v1159_v46 = vadd.f32 %v1079_v13, %v3711_v53 }
 0x2e9   :  { %3035 = vpow2.f32 %v2483_v34  ;;  %v2484_v14 = vmul.f32 -1.442695, %v1159_v46  ;;  %v4130_v46 = vld [vmem:[%s4633_s5 + $0x148] sm:$0xff] }
 0x2eb   :  { %3037 = vpow2.f32 %v2484_v14  ;;  %v4137_v14 = vld [vmem:[%s4633_s5 + $0x130] sm:$0xff] }
 0x2f6   :  { %v3036_v30 = vpop.eup %3035 }
 0x2f7   :  { %v1156_v16 = vadd.f32 1.0, %v3036_v30  ;;  %v4144_v30 = vld [vmem:[%s4633_s5 + $0x118] sm:$0xff] }
 0x2f8   :  { %v3038_v17 = vpop.eup %3037 }
 0x2f9   :  { %3039 = vrcp.f32 %v1156_v16  ;;  %v1163_v22 = vadd.f32 1.0, %v3038_v17  ;;  %v4151_v16 = vld [vmem:[%s4633_s5 + $0x100] sm:$0xff]  ;;  %v4158_v17 = vld [vmem:[%s4633_s5 + $0xe8] sm:$0xff] }
 0x2fb   :  { %3041 = vrcp.f32 %v1163_v22  ;;  %v4165_v22 = vld [vmem:[%s4633_s5 + $0xd0] sm:$0xff] }
 0x306   :  { %v3040_v27 = vpop.eup %3039 }
 0x307   :  { %v1167_v21 = vmul.f32 %v3040_v27, %v1166_v54  ;;  %v4170_v54 = vld [vmem:[%s4633_s5 + $0xb8] sm:$0xff]  ;;  %v4177_v27 = vld [vmem:[%s4633_s5 + $0xa0] sm:$0xff] }
 0x308   :  { %v3042_v35 = vpop.eup %3041 }
 0x309   :  { %v1168_v57 = vadd.f32 %v1167_v21, %v3725_v1  ;;  %v1170_v37 = vsub.f32 1.0, %v3042_v35  ;;  %v1172_v53 = vmul.f32 %v3042_v35, %v3833_v23  ;;  %v4116_v1 = vld [vmem:[%s4633_s5 + $0x178] sm:$0xff]  ;;  %v4123_v21 = vld [vmem:[%s4633_s5 + $0x160] sm:$0xff]  ;;  %v4191_v35 = vld [vmem:[%s4633_s5 + $0x70] sm:$0xff] }
 0x30b   :  { %3043 = vtanh.f32 %v1168_v57  ;;  %v4184_v57 = vld [vmem:[%s4633_s5 + $0x88] sm:$0xff] }
 0x318   :  { %v3044_v58 = vpop.eup %3043 }
 0x319   :  { %v1171_v34 = vmul.f32 %v3044_v58, %v1170_v37  ;;  %v4198_v37 = vld [vmem:[%s4633_s5 + $0x58] sm:$0xff]  ;;  %v4205_v58 = vld [vmem:[%s4633_s5 + $0x40] sm:$0xff] }
 0x31b   :  { %v4072_v13 = vadd.f32 %v1172_v53, %v1171_v34  ;;  %v4212_v34 = vld [vmem:[%s4633_s5 + $0x28] sm:$0xff]  ;;  %v4219_v53 = vld [vmem:[%s4633_s5 + $0x10] sm:$0xff] }
 0x31c   :  { %4739 = vst [vmem:[#allocation8_spill] sm:$0xff] %v4212_v34  ;;  %4740 = vst [vmem:[#allocation9_spill] sm:$0xff] %v4219_v53 }
 0x31d   :  { %4738 = vst [vmem:[#allocation17_spill] sm:$0xff] %v4072_v13  ;;  %1293 = vmatmul.mubr.f32.vlgmr.msra.gmra.mxu0 %v4072_v13  ;;  %2836 = vmatmul.mubr.f32.vlgmr.msra.gmra.mxu1 %v4072_v13  ;;  %v2278_v18 = vmul.f32 %v3754_v40, %v4072_v13 }
 0x31e   :  { %1446 = vmatpush1.msra.mxu0 %v3883_v4  ;;  %1509 = vmatprep.mubr.f32.mxu0 %v4714_v45 }
 0x31f   :  { %2288 = vadd.xlane.f32.xlu1 %v2278_v18  ;;  %1447 = vmatprep.subr.mxu0 %v3889_v5 }
 0x320   :  { %1448 = vmatpush1.msra.mxu0 %v3895_v6  ;;  %2870 = vmatprep.mubr.msk.f32.mxu1 %vm3116_vm1, %v4714_v45 }
 0x321   :  { %1449 = vmatprep.subr.mxu0 %v3901_v7  ;;  %2839 = vmatpush3.msra.mxu1 %v4116_v1 }
 0x322   :  { %1450 = vmatpush1.msra.mxu0 %v3907_v8  ;;  %2840 = vmatprep.subr.mxu1 %v4714_v45 }
 0x323   :  { %1451 = vmatprep.subr.mxu0 %v3913_v9  ;;  %2841 = vmatpush3.msra.mxu1 %v4123_v21 }
 0x324   :  { %1452 = vmatpush1.msra.mxu0 %v3919_v10  ;;  %2842 = vmatprep.subr.mxu1 %v4714_v45 }
 0x325   :  { %1453 = vmatprep.subr.mxu0 %v3925_v11  ;;  %2843 = vmatpush3.msra.mxu1 %v4130_v46 }
 0x326   :  { %1454 = vmatpush1.msra.mxu0 %v3931_v12  ;;  %2844 = vmatprep.subr.mxu1 %v4714_v45 }
 0x327   :  { %1455 = vmatprep.subr.mxu0 %v3937_v49  ;;  %2845 = vmatpush3.msra.mxu1 %v4137_v14 }
 0x328   :  { %1456 = vmatpush1.msra.mxu0 %v3943_v19  ;;  %2846 = vmatprep.subr.mxu1 %v4714_v45 }
 0x329   :  { %1457 = vmatprep.subr.mxu0 %v3949_v25  ;;  %2847 = vmatpush3.msra.mxu1 %v4144_v30 }
 0x32a   :  { %1458 = vmatpush1.msra.mxu0 %v3955_v29  ;;  %2848 = vmatprep.subr.mxu1 %v4714_v45 }
 0x32b   :  { %1459 = vmatprep.subr.mxu0 %v3961_v31  ;;  %2849 = vmatpush3.msra.mxu1 %v4151_v16 }
 0x32c   :  { %1460 = vmatpush1.msra.mxu0 %v3967_v33  ;;  %2850 = vmatprep.subr.mxu1 %v4714_v45 }
 0x32d   :  { %1461 = vmatprep.subr.mxu0 %v3972_v36  ;;  %2851 = vmatpush3.msra.mxu1 %v4158_v17 }
 0x32e   :  { %1462 = vmatpush1.msra.mxu0 %v3977_v39  ;;  %2852 = vmatprep.subr.mxu1 %v4714_v45 }
 0x32f   :  { %1463 = vmatprep.subr.mxu0 %v3983_v41  ;;  %2853 = vmatpush3.msra.mxu1 %v4165_v22 }
 0x330   :  { %1464 = vmatpush1.msra.mxu0 %v3989_v43  ;;  %2854 = vmatprep.subr.mxu1 %v4714_v45 }
 0x331   :  { %1465 = vmatprep.subr.mxu0 %v3995_v44  ;;  %2855 = vmatpush3.msra.mxu1 %v4170_v54 }
 0x332   :  { %1466 = vmatpush1.msra.mxu0 %v4001_v47  ;;  %2856 = vmatprep.subr.mxu1 %v4714_v45 }
 0x333   :  { %1467 = vmatprep.subr.mxu0 %v4007_v48  ;;  %2857 = vmatpush3.msra.mxu1 %v4177_v27 }
 0x334   :  { %1468 = vmatpush1.msra.mxu0 %v4013_v50  ;;  %2858 = vmatprep.subr.mxu1 %v4714_v45 }
 0x335   :  { %1469 = vmatprep.subr.mxu0 %v4019_v51  ;;  %2859 = vmatpush3.msra.mxu1 %v4184_v57 }
 0x336   :  { %1470 = vmatpush1.msra.mxu0 %v4025_v24  ;;  %2860 = vmatprep.subr.mxu1 %v4714_v45 }
 0x337   :  { %1471 = vmatprep.subr.mxu0 %v4031_v60  ;;  %2861 = vmatpush3.msra.mxu1 %v4191_v35 }
 0x338   :  { %1472 = vmatpush1.msra.mxu0 %v4037_v15  ;;  %2862 = vmatprep.subr.mxu1 %v4714_v45 }
 0x339   :  { %1473 = vmatprep.subr.mxu0 %v4043_v55  ;;  %2863 = vmatpush3.msra.mxu1 %v4198_v37 }
 0x33a   :  { %1474 = vmatpush1.msra.mxu0 %v4049_v38  ;;  %2864 = vmatprep.subr.mxu1 %v4714_v45 }
 0x33b   :  { %1475 = vmatprep.subr.mxu0 %v4055_v20  ;;  %2865 = vmatpush3.msra.mxu1 %v4205_v58 }
 0x33c   :  { %1476 = vmatpush1.msra.mxu0 %v4061_v28  ;;  %2866 = vmatprep.subr.mxu1 %v4714_v45 }
 0x33d   :  { %1662 = vmatprep.subr.mxu0 %v3877_v62  ;;  %2867 = vmatpush3.msra.mxu1 %v4212_v34 }
 0x33e   :  { %2868 = vmatprep.subr.mxu1 %v4714_v45 }
 0x33f   :  { %2869 = vmatpush3.msra.mxu1 %v4219_v53 }
 0x340   :  { %2873 = vmatprep.subr.mxu1 %v4714_v45 }
 0x3dd   :  { %v1294_v18 = vpop.f32.mrf.mxu0  ;;  %v1365_v23 = vpop.f32.mrf.mxu1 }
 0x3de   :  { %v1369_v63 = vadd.f32 %v1294_v18, %v3705_v56  ;;  %v1383_v53 = vadd.f32 %v3747_v59, %v1365_v23  ;;  %v4745_v23 = vld [vmem:[#allocation7_spill] sm:$0xff] }
 0x3df   :  { %v2837_v26 = vpop.f32.mrf.mxu1  ;;  %v1296_v3 = vpop.f32.mrf.mxu0 }
 0x3e0   :  { %v2485_v42 = vmul.f32 -1.442695, %v1369_v63  ;;  %v1376_v0 = vadd.f32 %v1296_v3, %v4741_v32  ;;  %v4744_v3 = vld [vmem:[#allocation6_spill] sm:$0xff] }
 0x3e2   :  { %3045 = vpow2.f32 %v2485_v42  ;;  %v2486_v52 = vmul.f32 -1.442695, %v1376_v0 }
 0x3e4   :  { %3047 = vpow2.f32 %v2486_v52  ;;  %v4743_v52 = vld [vmem:[#allocation8_spill] sm:$0xff] }
 0x3ef   :  { %v3046_v61 = vpop.eup %3045 }
 0x3f0   :  { %v1373_v62 = vadd.f32 1.0, %v3046_v61 }
 0x3f1   :  { %v3048_v28 = vpop.eup %3047 }
 0x3f2   :  { %3049 = vrcp.f32 %v1373_v62  ;;  %v1380_v20 = vadd.f32 1.0, %v3048_v28  ;;  %v4746_v62 = vld [vmem:[#allocation9_spill] sm:$0xff] }
 0x3f4   :  { %3051 = vrcp.f32 %v1380_v20 }
 0x3ff   :  { %v3050_v34 = vpop.eup %3049 }
 0x400   :  { %v1384_v38 = vmul.f32 %v3050_v34, %v1383_v53  ;;  %v4748_v34 = vld [vmem:[#allocation22_spill] sm:$0xff] }
 0x401   :  { %v3052_v63 = vpop.eup %3051 }
 0x402   :  { %v1385_v56 = vadd.f32 %v1384_v38, %v3727_v2  ;;  %v1387_v26 = vsub.f32 1.0, %v3052_v63  ;;  %v1389_v0 = vmul.f32 %v3052_v63, %v4072_v13  ;;  %v4742_v2 = vld [vmem:[#allocation16_spill] sm:$0xff]  ;;  %v4747_v38 = vld [vmem:[#allocation5_spill] sm:$0xff] }
 0x404   :  { %3053 = vtanh.f32 %v1385_v56 }
 0x411   :  { %v3054_v42 = vpop.eup %3053 }
 0x412   :  { %v1388_v18 = vmul.f32 %v3054_v42, %v1387_v26  ;;  %v4749_v42 = vld [vmem:[#allocation24_spill] sm:$0xff] }
 0x414   :  { %v4230_v32 = vadd.f32 %v1389_v0, %v1388_v18 }
 0x416   :  { %1510 = vmatmul.mubr.f32.vlgmr.msra.gmra.mxu0 %v4230_v32  ;;  %2871 = vmatmul.mubr.f32.vlgmr.msra.gmra.mxu1 %v4230_v32  ;;  %v2279_v61 = vmul.f32 %v3754_v40, %v4230_v32 }
 0x417   :  { %1663 = vmatpush1.msra.mxu0 %v3883_v4  ;;  %2874 = vmatpush3.msra.mxu1 %v4116_v1 }
 0x418   :  { %2290 = vadd.xlane.f32.xlu1 %v2279_v61  ;;  %1664 = vmatprep.subr.mxu0 %v3889_v5 }
 0x419   :  { %2875 = vmatprep.subr.mxu1 %v4714_v45  ;;  %1665 = vmatpush1.msra.mxu0 %v3895_v6 }
 0x41a   :  { %2876 = vmatpush3.msra.mxu1 %v4123_v21  ;;  %1666 = vmatprep.subr.mxu0 %v3901_v7 }
 0x41b   :  { %2877 = vmatprep.subr.mxu1 %v4714_v45  ;;  %1667 = vmatpush1.msra.mxu0 %v3907_v8 }
 0x41c   :  { %2878 = vmatpush3.msra.mxu1 %v4130_v46  ;;  %1668 = vmatprep.subr.mxu0 %v3913_v9 }
 0x41d   :  { %2879 = vmatprep.subr.mxu1 %v4714_v45  ;;  %1669 = vmatpush1.msra.mxu0 %v3919_v10 }
 0x41e   :  { %2880 = vmatpush3.msra.mxu1 %v4137_v14  ;;  %1670 = vmatprep.subr.mxu0 %v3925_v11 }
 0x41f   :  { %2881 = vmatprep.subr.mxu1 %v4714_v45  ;;  %1671 = vmatpush1.msra.mxu0 %v3931_v12 }
 0x420   :  { %2882 = vmatpush3.msra.mxu1 %v4144_v30  ;;  %1672 = vmatprep.subr.mxu0 %v3937_v49 }
 0x421   :  { %2883 = vmatprep.subr.mxu1 %v4714_v45  ;;  %1673 = vmatpush1.msra.mxu0 %v3943_v19 }
 0x422   :  { %2884 = vmatpush3.msra.mxu1 %v4151_v16  ;;  %1674 = vmatprep.subr.mxu0 %v3949_v25 }
 0x423   :  { %2885 = vmatprep.subr.mxu1 %v4714_v45  ;;  %1675 = vmatpush1.msra.mxu0 %v3955_v29 }
 0x424   :  { %2886 = vmatpush3.msra.mxu1 %v4158_v17  ;;  %1676 = vmatprep.subr.mxu0 %v3961_v31 }
 0x425   :  { %2887 = vmatprep.subr.mxu1 %v4714_v45  ;;  %1677 = vmatpush1.msra.mxu0 %v3967_v33 }
 0x426   :  { %2888 = vmatpush3.msra.mxu1 %v4165_v22  ;;  %1678 = vmatprep.subr.mxu0 %v3972_v36 }
 0x427   :  { %2889 = vmatprep.subr.mxu1 %v4714_v45  ;;  %1679 = vmatpush1.msra.mxu0 %v3977_v39 }
 0x428   :  { %2890 = vmatpush3.msra.mxu1 %v4170_v54  ;;  %1680 = vmatprep.subr.mxu0 %v3983_v41 }
 0x429   :  { %2891 = vmatprep.subr.mxu1 %v4714_v45  ;;  %1681 = vmatpush1.msra.mxu0 %v3989_v43 }
 0x42a   :  { %2892 = vmatpush3.msra.mxu1 %v4177_v27  ;;  %1682 = vmatprep.subr.mxu0 %v3995_v44 }
 0x42b   :  { %2893 = vmatprep.subr.mxu1 %v4714_v45  ;;  %1683 = vmatpush1.msra.mxu0 %v4001_v47 }
 0x42c   :  { %2894 = vmatpush3.msra.mxu1 %v4184_v57  ;;  %1684 = vmatprep.subr.mxu0 %v4007_v48 }
 0x42d   :  { %2895 = vmatprep.subr.mxu1 %v4714_v45  ;;  %1685 = vmatpush1.msra.mxu0 %v4013_v50 }
 0x42e   :  { %2896 = vmatpush3.msra.mxu1 %v4191_v35  ;;  %1686 = vmatprep.subr.mxu0 %v4019_v51 }
 0x42f   :  { %2897 = vmatprep.subr.mxu1 %v4714_v45  ;;  %1687 = vmatpush1.msra.mxu0 %v4025_v24 }
 0x430   :  { %2898 = vmatpush3.msra.mxu1 %v4198_v37  ;;  %1688 = vmatprep.subr.mxu0 %v4031_v60 }
 0x431   :  { %2899 = vmatprep.subr.mxu1 %v4714_v45  ;;  %1689 = vmatpush1.msra.mxu0 %v4037_v15 }
 0x432   :  { %2900 = vmatpush3.msra.mxu1 %v4205_v58  ;;  %1690 = vmatprep.subr.mxu0 %v4043_v55 }
 0x433   :  { %2901 = vmatprep.subr.mxu1 %v4714_v45  ;;  %1691 = vmatpush1.msra.mxu0 %v4742_v2  ;;  %v4750_v2 = vld [vmem:[#allocation29_spill] sm:$0xff] }
 0x434   :  { %2902 = vmatpush3.msra.mxu1 %v4743_v52  ;;  %1692 = vmatprep.subr.mxu0 %v4744_v3 }
 0x435   :  { %2903 = vmatprep.subr.mxu1 %v4714_v45  ;;  %1693 = vmatpush1.msra.mxu0 %v4745_v23 }
 0x436   :  { %1726 = vmatprep.mubr.f32.mxu0 %v4714_v45  ;;  %2904 = vmatpush3.msra.mxu1 %v4746_v62 }
 0x437   :  { %2905 = vmatprep.mubr.msk.f32.mxu1 %vm3116_vm1, %v4714_v45  ;;  %1879 = vmatprep.subr.mxu0 %v4747_v38 }
 0x438   :  { %2908 = vmatprep.subr.mxu1 %v4714_v45 }
 0x4d6   :  { %v1511_v20 = vpop.f32.mrf.mxu0  ;;  %v1582_v28 = vpop.f32.mrf.mxu1 }
 0x4d7   :  { %v1586_v53 = vadd.f32 %v1511_v20, %v4748_v34  ;;  %v1600_v38 = vadd.f32 %v3747_v59, %v1582_v28  ;;  %v2070_v28 = vld [vmem:[%s4633_s5 + $0xb0] sm:$0xff] }
 0x4d8   :  { %v2872_v56 = vpop.f32.mrf.mxu1  ;;  %v1513_v26 = vpop.f32.mrf.mxu0 }
 0x4d9   :  { %v2487_v63 = vmul.f32 -1.442695, %v1586_v53  ;;  %v1593_v18 = vadd.f32 %v1513_v26, %v4749_v42 }
 0x4db   :  { %3055 = vpow2.f32 %v2487_v63  ;;  %v2488_v0 = vmul.f32 -1.442695, %v1593_v18  ;;  %v2069_v18 = vld [vmem:[%s4633_s5 + $0xa8] sm:$0xff] }
 0x4dd   :  { %3057 = vpow2.f32 %v2488_v0  ;;  %v2067_v0 = vld [vmem:[%s4633_s5 + $0x98] sm:$0xff] }
 0x4e8   :  { %v3056_v61 = vpop.eup %3055 }
 0x4e9   :  { %v1590_v13 = vadd.f32 1.0, %v3056_v61  ;;  %v2066_v61 = vld [vmem:[%s4633_s5 + $0x90] sm:$0xff] }
 0x4ea   :  { %v3058_v62 = vpop.eup %3057 }
 0x4eb   :  { %3059 = vrcp.f32 %v1590_v13  ;;  %v1597_v23 = vadd.f32 1.0, %v3058_v62  ;;  %v2072_v62 = vld [vmem:[%s4633_s5 + $0xc0] sm:$0xff] }
 0x4ed   :  { %3061 = vrcp.f32 %v1597_v23  ;;  %v2073_v23 = vld [vmem:[%s4633_s5 + $0xc8] sm:$0xff] }
 0x4f8   :  { %v3060_v3 = vpop.eup %3059 }
 0x4f9   :  { %v1601_v52 = vmul.f32 %v3060_v3, %v1600_v38  ;;  %v2064_v38 = vld [vmem:[%s4633_s5 + $0x80] sm:$0xff] }
 0x4fa   :  { %v3062_v34 = vpop.eup %3061 }
 0x4fb   :  { %v1602_v20 = vadd.f32 %v1601_v52, %v4750_v2  ;;  %v1604_v53 = vsub.f32 1.0, %v3062_v34  ;;  %v1606_v26 = vmul.f32 %v3062_v34, %v4230_v32  ;;  %v4397_v52 = vld [vmem:[%s4638_s7] ss:$0 sm:$0xff]  ;;  %v2061_v34 = vld [vmem:[%s4633_s5 + $0x68] sm:$0xff] }
 0x4fd   :  { %3063 = vtanh.f32 %v1602_v20  ;;  %v2063_v20 = vld [vmem:[%s4633_s5 + $0x78] sm:$0xff] }
 0x50a   :  { %v3064_v56 = vpop.eup %3063 }
 0x50b   :  { %v1605_v63 = vmul.f32 %v3064_v56, %v1604_v53  ;;  %v2060_v53 = vld [vmem:[%s4633_s5 + $0x60] sm:$0xff]  ;;  %v2058_v56 = vld [vmem:[%s4633_s5 + $0x50] sm:$0xff] }
 0x50d   :  { %v4308_v42 = vadd.f32 %v1606_v26, %v1605_v63  ;;  %v2057_v63 = vld [vmem:[%s4633_s5 + $0x48] sm:$0xff]  ;;  %v2055_v26 = vld [vmem:[%s4633_s5 + $0x38] sm:$0xff] }
 0x50f   :  { %1727 = vmatmul.mubr.f32.vlgmr.msra.gmra.mxu0 %v4308_v42  ;;  %2906 = vmatmul.mubr.f32.vlgmr.msra.gmra.mxu1 %v4308_v42  ;;  %v2280_v59 = vmul.f32 %v3754_v40, %v4308_v42  ;;  %v4751_v40 = vld [vmem:[#allocation16_spill] sm:$0xff] }
 0x510   :  { %1880 = vmatpush1.msra.mxu0 %v3883_v4  ;;  %2909 = vmatpush3.msra.mxu1 %v4116_v1  ;;  %v4752_v4 = vld [vmem:[#allocation8_spill] sm:$0xff] }
 0x511   :  { %2292 = vadd.xlane.f32.xlu0 %v2280_v59  ;;  %1881 = vmatprep.subr.mxu0 %v3889_v5  ;;  %v4753_v5 = vld [vmem:[#allocation6_spill] sm:$0xff] }
 0x512   :  { %2910 = vmatprep.subr.mxu1 %v4714_v45  ;;  %1882 = vmatpush1.msra.mxu0 %v3895_v6  ;;  %v4754_v6 = vld [vmem:[#allocation7_spill] sm:$0xff]  ;;  %v2054_v59 = vld [vmem:[%s4633_s5 + $0x30] sm:$0xff] }
 0x513   :  { %2911 = vmatpush3.msra.mxu1 %v4123_v21  ;;  %1883 = vmatprep.subr.mxu0 %v3901_v7  ;;  %v4755_v7 = vld [vmem:[#allocation9_spill] sm:$0xff] }
 0x514   :  { %2912 = vmatprep.subr.mxu1 %v4714_v45  ;;  %1884 = vmatpush1.msra.mxu0 %v3907_v8 }
 0x515   :  { %2913 = vmatpush3.msra.mxu1 %v4130_v46  ;;  %1885 = vmatprep.subr.mxu0 %v3913_v9 }
 0x516   :  { %2914 = vmatprep.subr.mxu1 %v4714_v45  ;;  %1886 = vmatpush1.msra.mxu0 %v3919_v10  ;;  %v4756_v10 = vld [vmem:[#allocation25_spill] sm:$0xff] }
 0x517   :  { %2915 = vmatpush3.msra.mxu1 %v4137_v14  ;;  %1887 = vmatprep.subr.mxu0 %v3925_v11 }
 0x518   :  { %2916 = vmatprep.subr.mxu1 %v4714_v45  ;;  %1888 = vmatpush1.msra.mxu0 %v3931_v12 }
 0x519   :  { %2917 = vmatpush3.msra.mxu1 %v4144_v30  ;;  %1889 = vmatprep.subr.mxu0 %v3937_v49 }
 0x51a   :  { %2918 = vmatprep.subr.mxu1 %v4714_v45  ;;  %1890 = vmatpush1.msra.mxu0 %v3943_v19 }
 0x51b   :  { %2919 = vmatpush3.msra.mxu1 %v4151_v16  ;;  %1891 = vmatprep.subr.mxu0 %v3949_v25  ;;  %v4757_v25 = vld [vmem:[#allocation26_spill] sm:$0xff] }
 0x51c   :  { %2920 = vmatprep.subr.mxu1 %v4714_v45  ;;  %1892 = vmatpush1.msra.mxu0 %v3955_v29 }
 0x51d   :  { %2921 = vmatpush3.msra.mxu1 %v4158_v17  ;;  %1893 = vmatprep.subr.mxu0 %v3961_v31 }
 0x51e   :  { %2922 = vmatprep.subr.mxu1 %v4714_v45  ;;  %1894 = vmatpush1.msra.mxu0 %v3967_v33 }
 0x51f   :  { %2923 = vmatpush3.msra.mxu1 %v4165_v22  ;;  %1895 = vmatprep.subr.mxu0 %v3972_v36 }
 0x520   :  { %2924 = vmatprep.subr.mxu1 %v4714_v45  ;;  %1896 = vmatpush1.msra.mxu0 %v3977_v39 }
 0x521   :  { %2925 = vmatpush3.msra.mxu1 %v4170_v54  ;;  %1897 = vmatprep.subr.mxu0 %v3983_v41 }
 0x522   :  { %2926 = vmatprep.subr.mxu1 %v4714_v45  ;;  %1898 = vmatpush1.msra.mxu0 %v3989_v43  ;;  %v4385_v43 = vld [vmem:[%s4637_s6] ss:$0 sm:$0xff] }
 0x523   :  { %2927 = vmatpush3.msra.mxu1 %v4177_v27  ;;  %1899 = vmatprep.subr.mxu0 %v3995_v44 }
 0x524   :  { %2928 = vmatprep.subr.mxu1 %v4714_v45  ;;  %1900 = vmatpush1.msra.mxu0 %v4001_v47 }
 0x525   :  { %2929 = vmatpush3.msra.mxu1 %v4184_v57  ;;  %1901 = vmatprep.subr.mxu0 %v4007_v48 }
 0x526   :  { %2930 = vmatprep.subr.mxu1 %v4714_v45  ;;  %1902 = vmatpush1.msra.mxu0 %v4013_v50  ;;  %v4758_v50 = vld [vmem:[#allocation30_spill] sm:$0xff] }
 0x527   :  { %2931 = vmatpush3.msra.mxu1 %v4191_v35  ;;  %1903 = vmatprep.subr.mxu0 %v4019_v51 }
 0x528   :  { %2932 = vmatprep.subr.mxu1 %v4714_v45  ;;  %1904 = vmatpush1.msra.mxu0 %v4025_v24 }
 0x529   :  { %2933 = vmatpush3.msra.mxu1 %v4198_v37  ;;  %1905 = vmatprep.subr.mxu0 %v4031_v60 }
 0x52a   :  { %2934 = vmatprep.subr.mxu1 %v4714_v45  ;;  %1906 = vmatpush1.msra.mxu0 %v4037_v15 }
 0x52b   :  { %2935 = vmatpush3.msra.mxu1 %v4205_v58  ;;  %1907 = vmatprep.subr.mxu0 %v4043_v55 }
 0x52c   :  { %2936 = vmatprep.subr.mxu1 %v4714_v45  ;;  %1908 = vmatpush1.msra.mxu0 %v4751_v40  ;;  %v2052_v40 = vld [vmem:[%s4633_s5 + $0x20] sm:$0xff] }
 0x52d   :  { %2937 = vmatpush3.msra.mxu1 %v4752_v4  ;;  %1909 = vmatprep.subr.mxu0 %v4753_v5  ;;  %v2049_v5 = vld [vmem:[%s4633_s5 + $0x8] sm:$0xff] }
 0x52e   :  { %2938 = vmatprep.subr.mxu1 %v4714_v45  ;;  %1910 = vmatpush1.msra.mxu0 %v4754_v6  ;;  %v2048_v6 = vld [vmem:[%s4633_s5] sm:$0xff] }
 0x52f   :  { %1943 = vmatprep.mubr.f32.mxu0 %v4714_v45  ;;  %2939 = vmatpush3.msra.mxu1 %v4755_v7 }
 0x530   :  { %2940 = vmatprep.mubr.msk.f32.mxu1 %vm3116_vm1, %v4714_v45  ;;  %2943 = vmatprep.subr.mxu1 %v4714_v45 }
 0x5cf   :  { %v1728_v8 = vpop.f32.mrf.mxu0  ;;  %v1799_v9 = vpop.f32.mrf.mxu1 }
 0x5d0   :  { %v1803_v11 = vadd.f32 %v1728_v8, %v4756_v10  ;;  %v1817_v44 = vadd.f32 %v4385_v43, %v1799_v9  ;;  %v4759_v9 = vld [vmem:[#allocation27_spill] sm:$0xff] }
 0x5d1   :  { %v2907_v12 = vpop.f32.mrf.mxu1  ;;  %v1730_v19 = vpop.f32.mrf.mxu0 }
 0x5d2   :  { %v2489_v49 = vmul.f32 -1.442695, %v1803_v11  ;;  %v1810_v29 = vadd.f32 %v1730_v19, %v4757_v25  ;;  %v4760_v19 = vld [vmem:[#allocation28_spill] sm:$0xff] }
 0x5d4   :  { %3065 = vpow2.f32 %v2489_v49  ;;  %v2490_v31 = vmul.f32 -1.442695, %v1810_v29 }
 0x5d6   :  { %3067 = vpow2.f32 %v2490_v31 }
 0x5e1   :  { %v3066_v33 = vpop.eup %3065 }
 0x5e2   :  { %v1807_v36 = vadd.f32 1.0, %v3066_v33 }
 0x5e3   :  { %v3068_v39 = vpop.eup %3067 }
 0x5e4   :  { %3069 = vrcp.f32 %v1807_v36  ;;  %v1814_v41 = vadd.f32 1.0, %v3068_v39 }
 0x5e6   :  { %3071 = vrcp.f32 %v1814_v41 }
 0x5f1   :  { %v3070_v47 = vpop.eup %3069 }
 0x5f2   :  { %v1818_v48 = vmul.f32 %v3070_v47, %v1817_v44 }
 0x5f3   :  { %v3072_v24 = vpop.eup %3071 }
 0x5f4   :  { %v1819_v51 = vadd.f32 %v1818_v48, %v4758_v50  ;;  %v1821_v60 = vsub.f32 1.0, %v3072_v24  ;;  %v1823_v13 = vmul.f32 %v3072_v24, %v4308_v42  ;;  %v4761_v48 = vld [vmem:[#allocation31_spill] sm:$0xff] }
 0x5f6   :  { %3073 = vtanh.f32 %v1819_v51 }
 0x603   :  { %v3074_v15 = vpop.eup %3073 }
 0x604   :  { %v1822_v55 = vmul.f32 %v3074_v15, %v1821_v60 }
 0x606   :  { %v4390_v2 = vadd.f32 %v1823_v13, %v1822_v55 }
 0x608   :  { %1944 = vmatmul.mubr.f32.vlgmr.msra.gmra.mxu0 %v4390_v2  ;;  %2941 = vmatmul.mubr.f32.vlgmr.msra.gmra.mxu1 %v4390_v2  ;;  %v2281_v3 = vmul.f32 %v4397_v52, %v4390_v2 }
 0x609   :  { %2944 = vmatpush3.msra.mxu1 %v4116_v1  ;;  %2160 = vmatprep.mubr.f32.mxu0 %v4714_v45  ;;  %v2094_v1 = vld [vmem:[%s4633_s5 + $0x170] sm:$0xff] }
 0x60a   :  { %2294 = vadd.xlane.f32.xlu1 %v2281_v3  ;;  %2945 = vmatprep.subr.mxu1 %v4714_v45 }
 0x60b   :  { %2946 = vmatpush3.msra.mxu1 %v4123_v21  ;;  %2975 = vmatprep.mubr.msk.f32.mxu1 %vm3116_vm1, %v4714_v45  ;;  %v2093_v21 = vld [vmem:[%s4633_s5 + $0x168] sm:$0xff] }
 0x60c   :  { %2947 = vmatprep.subr.mxu1 %v4714_v45  ;;  %2096 = vmatprep.subr.mxu0 %v2094_v1 }
 0x60d   :  { %2948 = vmatpush3.msra.mxu1 %v4130_v46  ;;  %2097 = vmatpush1.msra.mxu0 %v2093_v21  ;;  %v2091_v46 = vld [vmem:[%s4633_s5 + $0x158] sm:$0xff] }
 0x60e   :  { %2949 = vmatprep.subr.mxu1 %v4714_v45  ;;  %2098 = vmatprep.subr.mxu0 %v2091_v46  ;;  %v4762_v46 = vld [vmem:[#allocation33_spill] sm:$0xff] }
 0x60f   :  { %2950 = vmatpush3.msra.mxu1 %v4137_v14  ;;  %v2090_v14 = vld [vmem:[%s4633_s5 + $0x150] sm:$0xff] }
 0x610   :  { %2951 = vmatprep.subr.mxu1 %v4714_v45  ;;  %2099 = vmatpush1.msra.mxu0 %v2090_v14 }
 0x611   :  { %2952 = vmatpush3.msra.mxu1 %v4144_v30  ;;  %v2088_v30 = vld [vmem:[%s4633_s5 + $0x140] sm:$0xff] }
 0x612   :  { %2953 = vmatprep.subr.mxu1 %v4714_v45  ;;  %2100 = vmatprep.subr.mxu0 %v2088_v30 }
 0x613   :  { %2954 = vmatpush3.msra.mxu1 %v4151_v16  ;;  %v2087_v16 = vld [vmem:[%s4633_s5 + $0x138] sm:$0xff] }
 0x614   :  { %2955 = vmatprep.subr.mxu1 %v4714_v45  ;;  %2101 = vmatpush1.msra.mxu0 %v2087_v16 }
 0x615   :  { %2956 = vmatpush3.msra.mxu1 %v4158_v17  ;;  %v2085_v17 = vld [vmem:[%s4633_s5 + $0x128] sm:$0xff] }
 0x616   :  { %2957 = vmatprep.subr.mxu1 %v4714_v45  ;;  %2102 = vmatprep.subr.mxu0 %v2085_v17 }
 0x617   :  { %2958 = vmatpush3.msra.mxu1 %v4165_v22  ;;  %v2084_v22 = vld [vmem:[%s4633_s5 + $0x120] sm:$0xff] }
 0x618   :  { %2959 = vmatprep.subr.mxu1 %v4714_v45  ;;  %2103 = vmatpush1.msra.mxu0 %v2084_v22  ;;  %v4763_v22 = vld [vmem:[#allocation34_spill] sm:$0xff] }
 0x619   :  { %2960 = vmatpush3.msra.mxu1 %v4170_v54  ;;  %v2082_v54 = vld [vmem:[%s4633_s5 + $0x110] sm:$0xff] }
 0x61a   :  { %2961 = vmatprep.subr.mxu1 %v4714_v45  ;;  %2104 = vmatprep.subr.mxu0 %v2082_v54 }
 0x61b   :  { %2962 = vmatpush3.msra.mxu1 %v4177_v27  ;;  %v2081_v27 = vld [vmem:[%s4633_s5 + $0x108] sm:$0xff] }
 0x61c   :  { %2963 = vmatprep.subr.mxu1 %v4714_v45  ;;  %2105 = vmatpush1.msra.mxu0 %v2081_v27 }
 0x61d   :  { %2964 = vmatpush3.msra.mxu1 %v4184_v57  ;;  %v2079_v57 = vld [vmem:[%s4633_s5 + $0xf8] sm:$0xff] }
 0x61e   :  { %2965 = vmatprep.subr.mxu1 %v4714_v45  ;;  %2106 = vmatprep.subr.mxu0 %v2079_v57 }
 0x61f   :  { %2966 = vmatpush3.msra.mxu1 %v4191_v35  ;;  %v2078_v35 = vld [vmem:[%s4633_s5 + $0xf0] sm:$0xff] }
 0x620   :  { %2967 = vmatprep.subr.mxu1 %v4714_v45  ;;  %2107 = vmatpush1.msra.mxu0 %v2078_v35 }
 0x621   :  { %2968 = vmatpush3.msra.mxu1 %v4198_v37  ;;  %v2076_v37 = vld [vmem:[%s4633_s5 + $0xe0] sm:$0xff] }
 0x622   :  { %2969 = vmatprep.subr.mxu1 %v4714_v45  ;;  %2108 = vmatprep.subr.mxu0 %v2076_v37 }
 0x623   :  { %2970 = vmatpush3.msra.mxu1 %v4205_v58  ;;  %v2075_v58 = vld [vmem:[%s4633_s5 + $0xd8] sm:$0xff] }
 0x624   :  { %2971 = vmatprep.subr.mxu1 %v4714_v45  ;;  %2109 = vmatpush1.msra.mxu0 %v2075_v58 }
 0x625   :  { %2972 = vmatpush3.msra.mxu1 %v4752_v4  ;;  %2110 = vmatprep.subr.mxu0 %v2073_v23  ;;  %v2051_v4 = vld [vmem:[%s4633_s5 + $0x18] sm:$0xff] }
 0x626   :  { %2973 = vmatprep.subr.mxu1 %v4714_v45  ;;  %2111 = vmatpush1.msra.mxu0 %v2072_v62 }
 0x627   :  { %2974 = vmatpush3.msra.mxu1 %v4755_v7  ;;  %2112 = vmatprep.subr.mxu0 %v2070_v28 }
 0x628   :  { %2113 = vmatpush1.msra.mxu0 %v2069_v18  ;;  %v4764_v18 = vld [vmem:[#allocation32_spill] sm:$0xff] }
 0x629   :  { %2114 = vmatprep.subr.mxu0 %v2067_v0 }
 0x62a   :  { %2115 = vmatpush1.msra.mxu0 %v2066_v61 }
 0x62b   :  { %2116 = vmatprep.subr.mxu0 %v2064_v38 }
 0x62c   :  { %2117 = vmatpush1.msra.mxu0 %v2063_v20 }
 0x62d   :  { %2118 = vmatprep.subr.mxu0 %v2061_v34 }
 0x62e   :  { %2119 = vmatpush1.msra.mxu0 %v2060_v53 }
 0x62f   :  { %2120 = vmatprep.subr.mxu0 %v2058_v56 }
 0x630   :  { %2121 = vmatpush1.msra.mxu0 %v2057_v63 }
 0x631   :  { %2122 = vmatprep.subr.mxu0 %v2055_v26  ;;  %v2376_v26 = vld [vmem:[%s4639_s8 + $0x70] sm:$0xff] }
 0x632   :  { %2123 = vmatpush1.msra.mxu0 %v2054_v59  ;;  %v2375_v59 = vld [vmem:[%s4639_s8 + $0x68] sm:$0xff] }
 0x633   :  { %2124 = vmatprep.subr.mxu0 %v2052_v40  ;;  %v2373_v40 = vld [vmem:[%s4639_s8 + $0x58] sm:$0xff] }
 0x634   :  { %2125 = vmatpush1.msra.mxu0 %v2051_v4  ;;  %v2372_v4 = vld [vmem:[%s4639_s8 + $0x50] sm:$0xff] }
 0x635   :  { %2126 = vmatprep.subr.mxu0 %v2049_v5  ;;  %v2371_v5 = vld [vmem:[%s4639_s8 + $0x48] sm:$0xff] }
 0x636   :  { %2127 = vmatpush1.msra.mxu0 %v2048_v6  ;;  %v2370_v6 = vld [vmem:[%s4639_s8 + $0x40] sm:$0xff] }
 0x637   :  { %2978 = vmatprep.subr.mxu0 %v4714_v45 }
 0x6c8   :  { %v1945_v7 = vpop.f32.mrf.mxu0  ;;  %v2016_v8 = vpop.f32.mrf.mxu1 }
 0x6c9   :  { %v2020_v10 = vadd.f32 %v1945_v7, %v4759_v9  ;;  %v2034_v41 = vadd.f32 %v4385_v43, %v2016_v8  ;;  %v2369_v7 = vld [vmem:[%s4639_s8 + $0x38] sm:$0xff]  ;;  %v2368_v8 = vld [vmem:[%s4639_s8 + $0x30] sm:$0xff]  ;;  %v2367_v9 = vld [vmem:[%s4639_s8 + $0x28] sm:$0xff] }
 0x6ca   :  { %v2942_v11 = vpop.f32.mrf.mxu1  ;;  %v1947_v49 = vpop.f32.mrf.mxu0 }
 0x6cb   :  { %v2491_v12 = vmul.f32 -1.442695, %v2020_v10  ;;  %v2027_v25 = vadd.f32 %v1947_v49, %v4760_v19  ;;  %v2366_v10 = vld [vmem:[%s4639_s8 + $0x20] sm:$0xff]  ;;  %v2365_v11 = vld [vmem:[%s4639_s8 + $0x18] sm:$0xff]  ;;  %v2363_v49 = vld [vmem:[%s4639_s8 + $0x8] sm:$0xff] }
 0x6cc   :  { %v2362_v19 = vld [vmem:[%s4639_s8] sm:$0xff] }
 0x6cd   :  { %3075 = vpow2.f32 %v2491_v12  ;;  %v2492_v29 = vmul.f32 -1.442695, %v2027_v25  ;;  %v2364_v12 = vld [vmem:[%s4639_s8 + $0x10] sm:$0xff]  ;;  %v2285_v25 = vpop.xlane.xlu0 %2284 }
 0x6cf   :  { %3077 = vpow2.f32 %v2492_v29  ;;  %v2289_v29 = vpop.xlane.xlu1 %2288 }
 0x6da   :  { %v3076_v31 = vpop.eup %3075 }
 0x6db   :  { %v2024_v33 = vadd.f32 1.0, %v3076_v31  ;;  %v2287_v31 = vpop.xlane.xlu0 %2286 }
 0x6dc   :  { %v3078_v36 = vpop.eup %3077 }
 0x6dd   :  { %3079 = vrcp.f32 %v2024_v33  ;;  %v2031_v39 = vadd.f32 1.0, %v3078_v36  ;;  %v2291_v33 = vpop.xlane.xlu1 %2290 }
 0x6df   :  { %3081 = vrcp.f32 %v2031_v39  ;;  %v2293_v36 = vpop.xlane.xlu0 %2292 }
 0x6e1   :  { %v2295_v39 = vpop.xlane.xlu1 %2294 }
 0x6ea   :  { %v3080_v44 = vpop.eup %3079 }
 0x6eb   :  { %v2035_v47 = vmul.f32 %v3080_v44, %v2034_v41  ;;  %v2301_v44 = vmax.f32 %v2287_v31, %v2295_v39 }
 0x6ec   :  { %v3082_v51 = vpop.eup %3081 }
 0x6ed   :  { %v2036_v50 = vadd.f32 %v2035_v47, %v4761_v48  ;;  %v2038_v24 = vsub.f32 1.0, %v3082_v51  ;;  %v2040_v55 = vmul.f32 %v3082_v51, %v4390_v2  ;;  %v2300_v48 = vmax.f32 %v2285_v25, %v2293_v36 }
 0x6ef   :  { %3083 = vtanh.f32 %v2036_v50 }
 0x6fc   :  { %v3084_v60 = vpop.eup %3083 }
 0x6fd   :  { %v2039_v15 = vmul.f32 %v3084_v60, %v2038_v24  ;;  %v2304_v24 = vmax.f32 %v2300_v48, %v2301_v44 }
 0x6ff   :  { %v4537_v13 = vadd.f32 %v2040_v55, %v2039_v15 }
 0x701   :  { %2161 = vmatmul.mubr.f32.vlgmr.msra.gmra.mxu0 %v4537_v13  ;;  %2976 = vmatmul.mubr.f32.vlgmr.msra.gmra.mxu1 %v4537_v13  ;;  %v2282_v3 = vmul.f32 %v4397_v52, %v4537_v13 }
 0x702   :  { %3010 = vmatprep.mubr.msk.f32.mxu0 %vm3116_vm1, %v4714_v45 }
 0x703   :  { %2296 = vadd.xlane.f32.xlu0 %v2282_v3 }
 0x78c   :  { %v2297_v41 = vpop.xlane.xlu0 %2296 }
 0x78d   :  { %v2302_v50 = vmax.f32 %v2289_v29, %v2297_v41 }
 0x7c1   :  { %v2162_v1 = vpop.f32.mrf.mxu0  ;;  %v2233_v21 = vpop.f32.mrf.mxu1 }
 0x7c2   :  { %v2237_v14 = vadd.f32 %v2162_v1, %v4762_v46  ;;  %v2251_v23 = vadd.f32 %v4385_v43, %v2233_v21  ;;  %v2377_v43 = vld [vmem:[%s4639_s8 + $0x78] sm:$0xff] }
 0x7c3   :  { %v2977_v30 = vpop.f32.mrf.mxu1  ;;  %v2164_v17 = vpop.f32.mrf.mxu0  ;;  %2979 = vmatpush3.msra.mxu0 %v2377_v43 }
 0x7c4   :  { %v2493_v16 = vmul.f32 -1.442695, %v2237_v14  ;;  %v2244_v54 = vadd.f32 %v2164_v17, %v4763_v22  ;;  %2980 = vmatprep.subr.mxu0 %v4714_v45 }
 0x7c5   :  { %2981 = vmatpush3.msra.mxu0 %v2376_v26 }
 0x7c6   :  { %3085 = vpow2.f32 %v2493_v16  ;;  %v2494_v27 = vmul.f32 -1.442695, %v2244_v54  ;;  %2982 = vmatprep.subr.mxu0 %v4714_v45 }
 0x7c7   :  { %2983 = vmatpush3.msra.mxu0 %v2375_v59 }
 0x7c8   :  { %3087 = vpow2.f32 %v2494_v27  ;;  %2984 = vmatprep.subr.mxu0 %v4714_v45 }
 0x7d3   :  { %v3086_v57 = vpop.eup %3085 }
 0x7d4   :  { %v2241_v35 = vadd.f32 1.0, %v3086_v57 }
 0x7d5   :  { %v3088_v37 = vpop.eup %3087 }
 0x7d6   :  { %3089 = vrcp.f32 %v2241_v35  ;;  %v2248_v58 = vadd.f32 1.0, %v3088_v37 }
 0x7d8   :  { %3091 = vrcp.f32 %v2248_v58 }
 0x7e3   :  { %v3090_v62 = vpop.eup %3089 }
 0x7e4   :  { %v2252_v28 = vmul.f32 %v3090_v62, %v2251_v23 }
 0x7e5   :  { %v3092_v61 = vpop.eup %3091 }
 0x7e6   :  { %v2253_v0 = vadd.f32 %v2252_v28, %v4764_v18  ;;  %v2255_v38 = vsub.f32 1.0, %v3092_v61  ;;  %v2257_v53 = vmul.f32 %v3092_v61, %v4537_v13 }
 0x7e8   :  { %3093 = vtanh.f32 %v2253_v0 }
 0x7f5   :  { %v3094_v20 = vpop.eup %3093 }
 0x7f6   :  { %v2256_v34 = vmul.f32 %v3094_v20, %v2255_v38 }
 0x7f8   :  { %v4550_v56 = vadd.f32 %v2257_v53, %v2256_v34 }
 0x7fa   :  { %v2283_v63 = vmul.f32 %v4397_v52, %v4550_v56  ;;  %v2374_v52 = vld [vmem:[%s4639_s8 + $0x60] sm:$0xff] }
 0x7fb   :  { %2985 = vmatpush3.msra.mxu0 %v2374_v52 }
 0x7fc   :  { %2298 = vadd.xlane.f32.xlu1 %v2283_v63  ;;  %2986 = vmatprep.subr.mxu0 %v4714_v45 }
 0x7fd   :  { %2987 = vmatpush3.msra.mxu0 %v2373_v40 }
 0x7fe   :  { %2988 = vmatprep.subr.mxu0 %v4714_v45 }
 0x7ff   :  { %2989 = vmatpush3.msra.mxu0 %v2372_v4 }
 0x800   :  { %2990 = vmatprep.subr.mxu0 %v4714_v45 }
 0x801   :  { %2991 = vmatpush3.msra.mxu0 %v2371_v5 }
 0x802   :  { %2992 = vmatprep.subr.mxu0 %v4714_v45 }
 0x803   :  { %2993 = vmatpush3.msra.mxu0 %v2370_v6 }
 0x804   :  { %2994 = vmatprep.subr.mxu0 %v4714_v45 }
 0x805   :  { %2995 = vmatpush3.msra.mxu0 %v2369_v7  ;;  %v4765_v7 = vld [vmem:[#allocation35_spill] sm:$0xff] }
 0x806   :  { %2996 = vmatprep.subr.mxu0 %v4714_v45 }
 0x807   :  { %2997 = vmatpush3.msra.mxu0 %v2368_v8 }
 0x808   :  { %2998 = vmatprep.subr.mxu0 %v4714_v45 }
 0x809   :  { %2999 = vmatpush3.msra.mxu0 %v2367_v9  ;;  %v4766_v9 = vld [vmem:[#allocation4_spill] sm:$0xff] }
 0x80a   :  { %3000 = vmatprep.subr.mxu0 %v4714_v45 }
 0x80b   :  { %3001 = vmatpush3.msra.mxu0 %v2366_v10 }
 0x80c   :  { %3002 = vmatprep.subr.mxu0 %v4714_v45 }
 0x80d   :  { %3003 = vmatpush3.msra.mxu0 %v2365_v11 }
 0x80e   :  { %3004 = vmatprep.subr.mxu0 %v4714_v45 }
 0x80f   :  { %3005 = vmatpush3.msra.mxu0 %v2364_v12  ;;  %v4767_v12 = vld [vmem:[#allocation17_spill] sm:$0xff] }
 0x810   :  { %3006 = vmatprep.subr.mxu0 %v4714_v45 }
 0x811   :  { %3007 = vmatpush3.msra.mxu0 %v2363_v49 }
 0x812   :  { %3008 = vmatprep.subr.mxu0 %v4714_v45 }
 0x813   :  { %3009 = vmatpush3.msra.mxu0 %v2362_v19 }
 0x885   :  { %v2299_v47 = vpop.xlane.xlu1 %2298 }
 0x886   :  { %v2303_v51 = vmax.f32 %v2291_v33, %v2299_v47 }
 0x888   :  { %v2305_v60 = vmax.f32 %v2302_v50, %v2303_v51 }
 0x88a   :  { %v2306_v15 = vmax.f32 %v2304_v24, %v2305_v60 }
 0x88c   :  { %v2307_v55 = vsub.f32 %v2285_v25, %v2306_v15  ;;  %v2308_v3 = vsub.f32 %v2287_v31, %v2306_v15  ;;  %v2309_v1 = vsub.f32 %v2289_v29, %v2306_v15  ;;  %v2310_v45 = vsub.f32 %v2291_v33, %v2306_v15 }
 0x88d   :  { %v2311_v14 = vsub.f32 %v2293_v36, %v2306_v15  ;;  %v2312_v16 = vsub.f32 %v2295_v39, %v2306_v15  ;;  %v2313_v22 = vsub.f32 %v2297_v41, %v2306_v15  ;;  %v2314_v27 = vsub.f32 %v2299_v47, %v2306_v15 }
 0x88e   :  { %v2315_v21 = vmul.f32 1.442695, %v2307_v55  ;;  %v2317_v46 = vmul.f32 1.442695, %v2308_v3  ;;  %v2319_v30 = vmul.f32 1.442695, %v2309_v1 }
 0x88f   :  { %v2321_v17 = vmul.f32 1.442695, %v2310_v45  ;;  %v2323_v54 = vmul.f32 1.442695, %v2311_v14  ;;  %v2325_v57 = vmul.f32 1.442695, %v2312_v16 }
 0x890   :  { %3095 = vpow2.f32 %v2315_v21  ;;  %v2327_v35 = vmul.f32 1.442695, %v2313_v22  ;;  %v2329_v37 = vmul.f32 1.442695, %v2314_v27 }
 0x891   :  { %3097 = vpow2.f32 %v2317_v46 }
 0x892   :  { %3099 = vpow2.f32 %v2319_v30 }
 0x893   :  { %3101 = vpow2.f32 %v2321_v17 }
 0x894   :  { %3103 = vpow2.f32 %v2323_v54 }
 0x895   :  { %3105 = vpow2.f32 %v2325_v57 }
 0x896   :  { %3107 = vpow2.f32 %v2327_v35 }
 0x897   :  { %3109 = vpow2.f32 %v2329_v37 }
 0x89d   :  { %v3096_v58 = vpop.eup %3095 }
 0x89e   :  { %v3098_v23 = vpop.eup %3097 }
 0x89f   :  { %v2331_v62 = vadd.f32 %v3098_v23, %v3096_v58  ;;  %v3100_v28 = vpop.eup %3099 }
 0x8a0   :  { %v3102_v0 = vpop.eup %3101 }
 0x8a1   :  { %v2332_v18 = vadd.f32 %v3100_v28, %v2331_v62  ;;  %v3104_v38 = vpop.eup %3103 }
 0x8a2   :  { %v3106_v34 = vpop.eup %3105 }
 0x8a3   :  { %v2333_v61 = vadd.f32 %v3102_v0, %v2332_v18  ;;  %v3108_v63 = vpop.eup %3107 }
 0x8a4   :  { %v3110_v26 = vpop.eup %3109 }
 0x8a5   :  { %v2334_v20 = vadd.f32 %v3104_v38, %v2333_v61 }
 0x8a7   :  { %v2335_v53 = vadd.f32 %v3106_v34, %v2334_v20 }
 0x8a9   :  { %v2336_v43 = vadd.f32 %v3108_v63, %v2335_v53 }
 0x8ab   :  { %v2337_v59 = vadd.f32 %v3110_v26, %v2336_v43 }
 0x8ad   :  { %3111 = vrcp.f32 %v2337_v59 }
 0x8ba   :  { %v3112_v52 = vpop.eup %3111 }
 0x8bb   :  { %v2339_v40 = vmul.f32 %v3112_v52, %v3096_v58  ;;  %v2340_v4 = vmul.f32 %v3112_v52, %v3098_v23  ;;  %v2341_v5 = vmul.f32 %v3112_v52, %v3100_v28  ;;  %v2342_v6 = vmul.f32 %v3112_v52, %v3102_v0 }
 0x8bc   :  { %v2343_v11 = vmul.f32 %v3112_v52, %v3104_v38  ;;  %v2344_v25 = vmul.f32 %v3112_v52, %v3106_v34  ;;  %v2345_v33 = vmul.f32 %v3112_v52, %v3108_v63  ;;  %v2346_v41 = vmul.f32 %v3112_v52, %v3110_v26 }
 0x8bd   :  { %v2347_v8 = vmul.f32 %v2339_v40, %v4765_v7  ;;  %v2348_v10 = vmul.f32 %v2340_v4, %v4766_v9  ;;  %v2349_v49 = vmul.f32 %v2341_v5, %v4767_v12  ;;  %v2350_v29 = vmul.f32 %v2342_v6, %v4230_v32  ;;  %v2496_v32 = vld [vmem:[%s4640_s9] ss:$0 sm:$0xff] }
 0x8be   :  { %v2351_v36 = vmul.f32 %v2343_v11, %v4308_v42  ;;  %v2352_v44 = vmul.f32 %v2344_v25, %v4390_v2  ;;  %v2353_v48 = vmul.f32 %v2345_v33, %v4537_v13  ;;  %v2354_v51 = vmul.f32 %v2346_v41, %v4550_v56 }
 0x8bf   :  { %v2355_v19 = vadd.f32 %v2348_v10, %v2347_v8 }
 0x8c1   :  { %v2356_v31 = vadd.f32 %v2355_v19, %v2349_v49 }
 0x8c3   :  { %v2357_v39 = vadd.f32 %v2356_v31, %v2350_v29 }
 0x8c5   :  { %v2358_v47 = vadd.f32 %v2357_v39, %v2351_v36 }
 0x8c7   :  { %v2359_v50 = vadd.f32 %v2358_v47, %v2352_v44 }
 0x8c9   :  { %v2360_v24 = vadd.f32 %v2359_v50, %v2353_v48 }
 0x8cb   :  { %v2361_v60 = vadd.f32 %v2360_v24, %v2354_v51 }
 0x8cd   :  { %3011 = vmatmul.mubr.f32.vlgmr.msra.gmra.mxu0 %v2361_v60 }
 0x98d   :  { %v2451_v15 = vpop.f32.mrf.mxu0 }
 0x98e   :  { %v2452_v55 = vadd.f32 %v2496_v32, %v2451_v15 }
 0x98f   :  { %v3012_v42 = vpop.f32.mrf.mxu0 }
 0x990   :  { %2455 = vst [vmem:[%s4641_s10] sm:$0xff] %v2452_v55 }

</bundles_post_ra>
